<compile_context>
chip_gen: v5e
topology: v5e:2x2
jax: 0.10.0
libtpu: 0.0.40
codegen_flags: <defaults>
</compile_context>

<pallas_src>
import functools

import jax
import jax.numpy as jnp
from jax import lax
from jax.experimental import pallas as pl
from jax.experimental.pallas import tpu as pltpu

LANE = 128
_VMEM_LIMIT = 48 * 1024 * 1024  # fits v7x's 64 MiB physical VMEM with headroom


# ----------------------------------------------------------------------------
# Small helpers
# ----------------------------------------------------------------------------
def _ceil_to(x, m):
    return ((x + m - 1) // m) * m


def _pad_to(a, shape):
    return jnp.pad(a, [(0, t - s) for s, t in zip(a.shape, shape)])


def _choose_row_tiling(m):
    # Row tile for the Local_op kernels: multiple of 8, capped at 512 rows so
    # double-buffered tiles stay far below VMEM while amortizing per-step cost.
    tm = min(512, _ceil_to(m, 8))
    mp = _ceil_to(m, tm)
    return tm, mp


def _cparams():
    return pltpu.CompilerParams(dimension_semantics=("parallel",),
                                vmem_limit_bytes=_VMEM_LIMIT)


def bn_scale_shift(s, ss, gamma, beta, count, eps=1e-5):
    # Training-mode BatchNorm finalize: batch statistics, biased variance.
    # s/ss are [1, Cp] global sums; returns per-channel affine (scale, shift).
    mean = s / count
    var = jnp.maximum(ss / count - mean * mean, 0.0)
    scale = gamma * lax.rsqrt(var + eps)
    shift = beta - mean * scale
    return scale, shift


# ----------------------------------------------------------------------------
# Pallas kernel 1: Local_op pass 1  (conv1 + per-tile partial BN1 stats)
# ----------------------------------------------------------------------------
def _local_proj1_kernel(x_ref, w1_ref, h_ref, s_ref, ss_ref):
    h = jnp.dot(x_ref[...], w1_ref[...], preferred_element_type=jnp.float32)
    h_ref[...] = h
    # conv1 has no bias and padded rows of x are zero => padded rows of h are
    # zero and contribute nothing to the statistics (no masking needed).
    s_ref[...] = jnp.sum(h, axis=0, keepdims=True)
    ss_ref[...] = jnp.sum(h * h, axis=0, keepdims=True)


def local_proj1(x, w1, tm):
    mp, fp = x.shape
    cp = w1.shape[1]
    gm = mp // tm
    return pl.pallas_call(
        _local_proj1_kernel,
        out_shape=(jax.ShapeDtypeStruct((mp, cp), jnp.float32),
                   jax.ShapeDtypeStruct((gm, 1, cp), jnp.float32),
                   jax.ShapeDtypeStruct((gm, 1, cp), jnp.float32)),
        grid=(gm,),
        in_specs=[pl.BlockSpec((tm, fp), lambda i: (i, 0)),
                  pl.BlockSpec((fp, cp), lambda i: (0, 0))],
        out_specs=(pl.BlockSpec((tm, cp), lambda i: (i, 0)),
                   pl.BlockSpec((None, 1, cp), lambda i: (i, 0, 0)),
                   pl.BlockSpec((None, 1, cp), lambda i: (i, 0, 0))),
        compiler_params=_cparams(),
    )(x, w1)


# ----------------------------------------------------------------------------
# Pallas kernel 2: Local_op pass 2  (bn1+relu fused, conv2, partial BN2 stats)
# ----------------------------------------------------------------------------
def _local_proj2_kernel(m_true, tm, h1_ref, sc_ref, sh_ref, w2_ref,
                        h2_ref, s_ref, ss_ref):
    a = jnp.maximum(h1_ref[...] * sc_ref[...] + sh_ref[...], 0.0)  # bn1 + relu
    h2 = jnp.dot(a, w2_ref[...], preferred_element_type=jnp.float32)
    h2_ref[...] = h2
    # bn1's shift makes padded rows nonzero: mask them out of the BN2 stats.
    rows = lax.broadcasted_iota(jnp.int32, h2.shape, 0) + pl.program_id(0) * tm
    h2m = h2 * (rows < m_true).astype(h2.dtype)
    s_ref[...] = jnp.sum(h2m, axis=0, keepdims=True)
    ss_ref[...] = jnp.sum(h2m * h2m, axis=0, keepdims=True)


def local_proj2(h1, scale1, shift1, w2, tm, m_true):
    mp, cp = h1.shape
    gm = mp // tm
    kernel = functools.partial(_local_proj2_kernel, m_true, tm)
    return pl.pallas_call(
        kernel,
        out_shape=(jax.ShapeDtypeStruct((mp, cp), jnp.float32),
                   jax.ShapeDtypeStruct((gm, 1, cp), jnp.float32),
                   jax.ShapeDtypeStruct((gm, 1, cp), jnp.float32)),
        grid=(gm,),
        in_specs=[pl.BlockSpec((tm, cp), lambda i: (i, 0)),
                  pl.BlockSpec((1, cp), lambda i: (0, 0)),
                  pl.BlockSpec((1, cp), lambda i: (0, 0)),
                  pl.BlockSpec((cp, cp), lambda i: (0, 0))],
        out_specs=(pl.BlockSpec((tm, cp), lambda i: (i, 0)),
                   pl.BlockSpec((None, 1, cp), lambda i: (i, 0, 0)),
                   pl.BlockSpec((None, 1, cp), lambda i: (i, 0, 0))),
        compiler_params=_cparams(),
    )(h1, scale1, shift1, w2)


# ----------------------------------------------------------------------------
# Pallas kernel 3: SA_Layer core (PCT offset-attention), grid over batch.
# Prologue finalizes the previous stage's BN+ReLU (+ residual); epilogue BN is
# deferred: the kernel emits y = trans_conv(x - x_r) plus partial statistics.
# ----------------------------------------------------------------------------
def _sa_core_kernel(has_base, *refs):
    if has_base:
        (base_ref, xin_ref, sc_ref, sh_ref,
         wq_ref, wv_ref, bv_ref, wt_ref, bt_ref,
         xout_ref, y_ref, s_ref, ss_ref) = refs
    else:
        (xin_ref, sc_ref, sh_ref,
         wq_ref, wv_ref, bv_ref, wt_ref, bt_ref,
         xout_ref, y_ref, s_ref, ss_ref) = refs

    # Prologue: finalize previous BatchNorm + ReLU (+ residual add).
    pre = jnp.maximum(xin_ref[...] * sc_ref[...] + sh_ref[...], 0.0)   # [S, Cp]
    if has_base:
        x = base_ref[...] + pre
    else:
        x = pre
    xout_ref[...] = x                       # residual base for the next stage

    # q_conv == k_conv (shared weight, bias=False); v_conv has a bias.
    q = jnp.dot(x, wq_ref[...], preferred_element_type=jnp.float32)    # [S, Cqp]
    v = jnp.dot(x, wv_ref[...], preferred_element_type=jnp.float32) + bv_ref[...]

    # energy[n, m] = <q_n, k_m>  with k == q
    energy = lax.dot_general(q, q, (((1,), (1,)), ((), ())),
                             preferred_element_type=jnp.float32)       # [S, S]
    e = jnp.exp(energy - jnp.max(energy, axis=-1, keepdims=True))
    attn = e * pl.reciprocal(jnp.sum(e, axis=-1, keepdims=True), approx=True)
    attn = attn * pl.reciprocal(1e-9 + jnp.sum(attn, axis=0, keepdims=True),
                                approx=True)

    # x_r[j, c] = sum_m attn[m, j] * v[m, c]  (== x_v @ attention in NCL layout)
    x_r = lax.dot_general(attn, v, (((0,), (0,)), ((), ())),
                          preferred_element_type=jnp.float32)          # [S, Cp]

    # trans_conv(x - x_r); after_norm + ReLU + residual finalized downstream.
    y = jnp.dot(x - x_r, wt_ref[...],
                preferred_element_type=jnp.float32) + bt_ref[...]
    y_ref[...] = y
    s_ref[...] = jnp.sum(y, axis=0, keepdims=True)
    ss_ref[...] = jnp.sum(y * y, axis=0, keepdims=True)


def sa_core(x_in, scale_in, shift_in, wq, wv, bv, wt, bt, base=None):
    b, s, cp = x_in.shape
    cqp = wq.shape[1]
    feat_spec = pl.BlockSpec((None, s, cp), lambda i: (i, 0, 0))
    vec_spec = pl.BlockSpec((1, cp), lambda i: (0, 0))
    stat_spec = pl.BlockSpec((None, 1, cp), lambda i: (i, 0, 0))

    inputs, in_specs = [], []
    if base is not None:
        inputs.append(base)
        in_specs.append(feat_spec)
    inputs += [x_in, scale_in, shift_in, wq, wv, bv, wt, bt]
    in_specs += [feat_spec, vec_spec, vec_spec,
                 pl.BlockSpec((cp, cqp), lambda i: (0, 0)),
                 pl.BlockSpec((cp, cp), lambda i: (0, 0)),
                 vec_spec,
                 pl.BlockSpec((cp, cp), lambda i: (0, 0)),
                 vec_spec]

    return pl.pallas_call(
        functools.partial(_sa_core_kernel, base is not None),
        out_shape=(jax.ShapeDtypeStruct((b, s, cp), jnp.float32),
                   jax.ShapeDtypeStruct((b, s, cp), jnp.float32),
                   jax.ShapeDtypeStruct((b, 1, cp), jnp.float32),
                   jax.ShapeDtypeStruct((b, 1, cp), jnp.float32)),
        grid=(b,),
        in_specs=in_specs,
        out_specs=(feat_spec, feat_spec, stat_spec, stat_spec),
        compiler_params=_cparams(),
    )(*inputs)


# ----------------------------------------------------------------------------
# Pallas kernel 4: epilogue  out = base + relu(bn(y))   (lane-dense stores)
# ----------------------------------------------------------------------------
def _residual_bn_relu_kernel(base_ref, y_ref, sc_ref, sh_ref, o_ref):
    o_ref[...] = base_ref[...] + jnp.maximum(
        y_ref[...] * sc_ref[...] + sh_ref[...], 0.0)


def residual_bn_relu(base, y, scale, shift):
    b, s, cp = base.shape
    feat_spec = pl.BlockSpec((None, s, cp), lambda i: (i, 0, 0))
    vec_spec = pl.BlockSpec((1, cp), lambda i: (0, 0))
    return pl.pallas_call(
        _residual_bn_relu_kernel,
        out_shape=jax.ShapeDtypeStruct((b, s, cp), jnp.float32),
        grid=(b,),
        in_specs=[feat_spec, feat_spec, vec_spec, vec_spec],
        out_specs=feat_spec,
        compiler_params=_cparams(),
    )(base, y, scale, shift)


# ----------------------------------------------------------------------------
# Plain-JAX glue: sampling / grouping (data-dependent gather & sort)
# TODO(synk): FPS / ball-query sort / gathers stay in plain JAX — the
#             data-dependent gather+sort has no clean Pallas-TPU win here.
# ----------------------------------------------------------------------------
def index_points(points, idx):
    return jax.vmap(lambda p, i: p[i])(points, idx)


def square_distance(src, dst):
    dist = -2.0 * jnp.einsum('bnc,bmc->bnm', src, dst)
    dist = dist + jnp.sum(src ** 2, -1)[:, :, None]
    dist = dist + jnp.sum(dst ** 2, -1)[:, None, :]
    return dist


def farthest_point_sample(xyz, npoint, init_farthest):
    B, N, _ = xyz.shape

    def body(i, carry):
        centroids, distance, farthest = carry
        centroids = centroids.at[:, i].set(farthest)
        centroid = index_points(xyz, farthest[:, None])          # [B, 1, 3]
        dist = jnp.sum((xyz - centroid) ** 2, -1)
        distance = jnp.minimum(distance, dist)
        farthest = jnp.argmax(distance, axis=-1).astype(jnp.int32)
        return centroids, distance, farthest

    centroids0 = jnp.zeros((B, npoint), jnp.int32)
    distance0 = jnp.full((B, N), 1e10, jnp.float32)
    centroids, _, _ = lax.fori_loop(0, npoint, body,
                                    (centroids0, distance0, init_farthest))
    return centroids


def query_ball_point(radius, nsample, xyz, new_xyz):
    B, N, _ = xyz.shape
    S = new_xyz.shape[1]
    sqrdists = square_distance(new_xyz, xyz)                     # [B, S, N]
    group_idx = jnp.broadcast_to(jnp.arange(N, dtype=jnp.int32)[None, None, :],
                                 (B, S, N))
    group_idx = jnp.where(sqrdists > radius ** 2, N, group_idx)
    group_idx = jnp.sort(group_idx, axis=-1)[:, :, :nsample]
    group_first = group_idx[:, :, 0:1]
    group_idx = jnp.where(group_idx == N, group_first, group_idx)
    return group_idx


def sample_and_group(npoint, radius, nsample, xyz, points, init_farthest):
    fps_idx = farthest_point_sample(xyz, npoint, init_farthest)
    new_xyz = index_points(xyz, fps_idx)                         # [B, S, 3]
    idx = query_ball_point(radius, nsample, xyz, new_xyz)        # [B, S, nsample]
    grouped_xyz = index_points(xyz, idx)                         # [B, S, ns, 3]
    grouped_xyz_norm = grouped_xyz - new_xyz[:, :, None, :]
    if points is not None:
        grouped_points = index_points(points, idx)
        new_points = jnp.concatenate([grouped_xyz_norm, grouped_points], axis=-1)
    else:
        new_points = grouped_xyz_norm
    return new_xyz, new_points


# ----------------------------------------------------------------------------
# Parameters (PyTorch-logical shapes, stored transposed [Cin, Cout] and
# zero-padded to lane-aligned widths; padded BN gammas are 0 so padded
# channels stay identically zero through the whole pipeline).
# ----------------------------------------------------------------------------
def init_params(key, in_channel, nsample, out_channel, R=4):
    fin = in_channel * nsample
    c, cq = out_channel, out_channel // R
    fp, cp, cqp = _ceil_to(fin, LANE), _ceil_to(c, LANE), _ceil_to(cq, LANE)
    ks = jax.random.split(key, 12)
    w = lambda k, shape: 0.1 * jax.random.normal(k, shape, jnp.float32)
    gamma = _pad_to(jnp.ones((1, c), jnp.float32), (1, cp))
    beta = jnp.zeros((1, cp), jnp.float32)

    def sa(kq, kv, kbv, kt, kbt):
        return {'wq': _pad_to(w(kq, (c, cq)), (cp, cqp)),
                'wv': _pad_to(w(kv, (c, c)), (cp, cp)),
                'bv': _pad_to(w(kbv, (1, c)), (1, cp)),
                'wt': _pad_to(w(kt, (c, c)), (cp, cp)),
                'bt': _pad_to(w(kbt, (1, c)), (1, cp)),
                'gamma': gamma, 'beta': beta}

    return {'local': {'w1': _pad_to(w(ks[0], (fin, c)), (fp, cp)),
                      'g1': gamma, 'b1': beta,
                      'w2': _pad_to(w(ks[1], (c, c)), (cp, cp)),
                      'g2': gamma, 'b2': beta},
            'tb1': sa(ks[2], ks[3], ks[4], ks[5], ks[6]),
            'tb2': sa(ks[7], ks[8], ks[9], ks[10], ks[11])}


# ----------------------------------------------------------------------------
# Module wrapper (forward pass of PointNetSetAbstraction_withTransformer)
# ----------------------------------------------------------------------------
def pointnet_sa_with_transformer(xyz, points, params, npoint, radius, nsample,
                                 out_channel, init_farthest):
    lp, t1, t2 = params['local'], params['tb1'], params['tb2']
    fp, cp = lp['w1'].shape                                       # padded widths

    xyz_t = jnp.transpose(xyz, (0, 2, 1))
    points_t = jnp.transpose(points, (0, 2, 1)) if points is not None else None
    new_xyz, new_points = sample_and_group(npoint, radius, nsample,
                                           xyz_t, points_t, init_farthest)

    b, s, ns, d = new_points.shape
    m = b * s
    tm, mp = _choose_row_tiling(m)
    x_flat = _pad_to(new_points.reshape(m, ns * d), (mp, fp))     # zero pad (exact)

    # ---- Local_op: conv1 -> bn1 -> relu -> conv2 -> bn2 -> relu -------------
    h1, s1, q1 = local_proj1(x_flat, lp['w1'], tm)
    sc1, sh1 = bn_scale_shift(jnp.sum(s1, 0), jnp.sum(q1, 0),
                              lp['g1'], lp['b1'], m)
    h2, s2, q2 = local_proj2(h1, sc1, sh1, lp['w2'], tm, m)
    sc2, sh2 = bn_scale_shift(jnp.sum(s2, 0), jnp.sum(q2, 0),
                              lp['g2'], lp['b2'], m)

    feat = h2[:m].reshape(b, s, cp)      # [B, S, Cp], channel-last, lane-dense

    # ---- SA layer 1 (Local_op's bn2+relu fused as prologue) -----------------
    x1, y1, sy1, qy1 = sa_core(feat, sc2, sh2, t1['wq'], t1['wv'], t1['bv'],
                               t1['wt'], t1['bt'])
    scy1, shy1 = bn_scale_shift(jnp.sum(sy1, 0), jnp.sum(qy1, 0),
                                t1['gamma'], t1['beta'], m)
    # ---- SA layer 2 (SA1's after_norm+relu+residual fused as prologue) ------
    x2, y2, sy2, qy2 = sa_core(y1, scy1, shy1, t2['wq'], t2['wv'], t2['bv'],
                               t2['wt'], t2['bt'], base=x1)
    scy2, shy2 = bn_scale_shift(jnp.sum(sy2, 0), jnp.sum(qy2, 0),
                                t2['gamma'], t2['beta'], m)
    # ---- SA2 epilogue: out = x2 + relu(after_norm(y2)) ----------------------
    feat_out = residual_bn_relu(x2, y2, scy2, shy2)

    new_xyz_out = jnp.transpose(new_xyz, (0, 2, 1))               # [B, 3, S]
    new_points_out = jnp.transpose(feat_out[..., :out_channel], (0, 2, 1))
    return new_xyz_out, new_points_out


if __name__ == "__main__":
    B, N, D = 2, 64, 4
    npoint, radius, nsample, out_channel = 16, 0.4, 8, 32
    in_channel = D + 3   # grouped features = [xyz_norm(3), point_feats(D)]

    key = jax.random.PRNGKey(0)
    k_xyz, k_pts, k_fps, k_par = jax.random.split(key, 4)
    xyz = jax.random.uniform(k_xyz, (B, 3, N), jnp.float32)
    points = jax.random.normal(k_pts, (B, D, N), jnp.float32)
    # deterministic stand-in for torch.randint FPS seed points
    init_farthest = jax.random.randint(k_fps, (B,), 0, N, jnp.int32)

    params = init_params(k_par, in_channel, nsample, out_channel)

    @jax.jit
    def fwd(xyz, points, params, init_farthest):
        return pointnet_sa_with_transformer(
            xyz, points, params, npoint, radius, nsample, out_channel,
            init_farthest)

    new_xyz, new_points = fwd(xyz, points, params, init_farthest)
    jax.block_until_ready((new_xyz, new_points))

    assert new_xyz.shape == (B, 3, npoint)
    assert new_points.shape == (B, out_channel, npoint)
    assert bool(jnp.all(jnp.isfinite(new_xyz)))
    assert bool(jnp.all(jnp.isfinite(new_points)))
    print("KERNEL_OK")
</pallas_src>

<mosaic_0001>
module attributes {stable_mosaic.version = 11 : i64} {
  func.func @_local_proj1_kernel(%arg0: i32, %arg1: memref<32x128xf32, #tpu.memory_space<vmem>>, %arg2: memref<128x128xf32, #tpu.memory_space<vmem>>, %arg3: memref<32x128xf32, #tpu.memory_space<vmem>>, %arg4: memref<1x1x128xf32, #tpu.memory_space<vmem>>, %arg5: memref<1x1x128xf32, #tpu.memory_space<vmem>>) attributes {dimension_semantics = [#tpu.dimension_semantics<parallel>], iteration_bounds = array<i64: 1>, scalar_prefetch = 0 : i64, scratch_operands = 0 : i64, tpu.core_type = #tpu.core_type<tc>, window_params = [{transform_indices = @transform_0, window_bounds = array<i64: 32, 128>}, {pipeline_mode = #tpu.pipeline_mode<synchronous>, transform_indices = @transform_1, window_bounds = array<i64: 128, 128>}, {transform_indices = @transform_2, window_bounds = array<i64: 32, 128>}, {transform_indices = @transform_3, window_bounds = array<i64: 1, 1, 128>}, {transform_indices = @transform_4, window_bounds = array<i64: 1, 1, 128>}]} {
    %c0 = arith.constant 0 : index
    %c0_0 = arith.constant 0 : index
    %0 = vector.load %arg1[%c0, %c0_0] : memref<32x128xf32, #tpu.memory_space<vmem>>, vector<32x128xf32>
    %c0_1 = arith.constant 0 : index
    %c0_2 = arith.constant 0 : index
    %1 = vector.load %arg2[%c0_1, %c0_2] : memref<128x128xf32, #tpu.memory_space<vmem>>, vector<128x128xf32>
    %cst = arith.constant dense<0.000000e+00> : vector<32x128xf32>
    %2 = tpu.matmul %0, %1, %cst {dimension_numbers = #tpu.dot_dimension_numbers<[1], [0], [0], [1], [0, 0, 1, 1], [], []>} : vector<32x128xf32>, vector<128x128xf32>, vector<32x128xf32> -> vector<32x128xf32>
    %c0_3 = arith.constant 0 : index
    %c0_4 = arith.constant 0 : index
    %3 = vector.load %arg3[%c0_3, %c0_4] : memref<32x128xf32, #tpu.memory_space<vmem>>, vector<32x128xf32>
    tpu.vector_store %arg3[%c0_3, %c0_4], %2 {strides = array<i32>} : memref<32x128xf32, #tpu.memory_space<vmem>>, vector<32x128xf32>,
    %cst_5 = arith.constant dense<0.000000e+00> : vector<128xf32>
    %4 = vector.multi_reduction <add>, %2, %cst_5 [0] : vector<32x128xf32> to vector<128xf32>
    %5 = vector.shape_cast %4 : vector<128xf32> to vector<1x128xf32>
    %c0_6 = arith.constant 0 : index
    %c0_7 = arith.constant 0 : index
    %c0_8 = arith.constant 0 : index
    %6 = vector.load %arg4[%c0_6, %c0_7, %c0_8] : memref<1x1x128xf32, #tpu.memory_space<vmem>>, vector<1x1x128xf32>
    %7 = vector.shape_cast %6 : vector<1x1x128xf32> to vector<1x128xf32>
    %8 = vector.shape_cast %5 : vector<1x128xf32> to vector<1x1x128xf32>
    tpu.vector_store %arg4[%c0_6, %c0_7, %c0_8], %8 {strides = array<i32>} : memref<1x1x128xf32, #tpu.memory_space<vmem>>, vector<1x1x128xf32>,
    %9 = arith.mulf %2, %2 : vector<32x128xf32>
    %cst_9 = arith.constant dense<0.000000e+00> : vector<128xf32>
    %10 = vector.multi_reduction <add>, %9, %cst_9 [0] : vector<32x128xf32> to vector<128xf32>
    %11 = vector.shape_cast %10 : vector<128xf32> to vector<1x128xf32>
    %c0_10 = arith.constant 0 : index
    %c0_11 = arith.constant 0 : index
    %c0_12 = arith.constant 0 : index
    %12 = vector.load %arg5[%c0_10, %c0_11, %c0_12] : memref<1x1x128xf32, #tpu.memory_space<vmem>>, vector<1x1x128xf32>
    %13 = vector.shape_cast %12 : vector<1x1x128xf32> to vector<1x128xf32>
    %14 = vector.shape_cast %11 : vector<1x128xf32> to vector<1x1x128xf32>
    tpu.vector_store %arg5[%c0_10, %c0_11, %c0_12], %14 {strides = array<i32>} : memref<1x1x128xf32, #tpu.memory_space<vmem>>, vector<1x1x128xf32>,
    return
  }
  func.func @transform_0(%arg0: i32) -> (i32, i32) {
    %c0_i32 = arith.constant 0 : i32
    %c0_i32_0 = arith.constant 0 : i32
    return %arg0, %c0_i32 : i32, i32
  }
  func.func @transform_1(%arg0: i32) -> (i32, i32) {
    %c0_i32 = arith.constant 0 : i32
    %c0_i32_0 = arith.constant 0 : i32
    %c0_i32_1 = arith.constant 0 : i32
    return %c0_i32, %c0_i32_0 : i32, i32
  }
  func.func @transform_2(%arg0: i32) -> (i32, i32) {
    %c0_i32 = arith.constant 0 : i32
    %c0_i32_0 = arith.constant 0 : i32
    return %arg0, %c0_i32 : i32, i32
  }
  func.func @transform_3(%arg0: i32) -> (i32, i32, i32) {
    %c0_i32 = arith.constant 0 : i32
    %c0_i32_0 = arith.constant 0 : i32
    %c0_i32_1 = arith.constant 0 : i32
    return %arg0, %c0_i32, %c0_i32_0 : i32, i32, i32
  }
  func.func @transform_4(%arg0: i32) -> (i32, i32, i32) {
    %c0_i32 = arith.constant 0 : i32
    %c0_i32_0 = arith.constant 0 : i32
    %c0_i32_1 = arith.constant 0 : i32
    return %arg0, %c0_i32, %c0_i32_0 : i32, i32, i32
  }
}

module attributes {stable_mosaic.version = 11 : i64} {
  func.func @_local_proj2_kernel(%arg0: i32, %arg1: memref<32x128xf32, #tpu.memory_space<vmem>>, %arg2: memref<1x128xf32, #tpu.memory_space<vmem>>, %arg3: memref<1x128xf32, #tpu.memory_space<vmem>>, %arg4: memref<128x128xf32, #tpu.memory_space<vmem>>, %arg5: memref<32x128xf32, #tpu.memory_space<vmem>>, %arg6: memref<1x1x128xf32, #tpu.memory_space<vmem>>, %arg7: memref<1x1x128xf32, #tpu.memory_space<vmem>>) attributes {dimension_semantics = [#tpu.dimension_semantics<parallel>], iteration_bounds = array<i64: 1>, scalar_prefetch = 0 : i64, scratch_operands = 0 : i64, tpu.core_type = #tpu.core_type<tc>, window_params = [{transform_indices = @transform_0, window_bounds = array<i64: 32, 128>}, {pipeline_mode = #tpu.pipeline_mode<synchronous>, transform_indices = @transform_1, window_bounds = array<i64: 1, 128>}, {pipeline_mode = #tpu.pipeline_mode<synchronous>, transform_indices = @transform_2, window_bounds = array<i64: 1, 128>}, {pipeline_mode = #tpu.pipeline_mode<synchronous>, transform_indices = @transform_3, window_bounds = array<i64: 128, 128>}, {transform_indices = @transform_4, window_bounds = array<i64: 32, 128>}, {transform_indices = @transform_5, window_bounds = array<i64: 1, 1, 128>}, {transform_indices = @transform_6, window_bounds = array<i64: 1, 1, 128>}]} {
    %c0 = arith.constant 0 : index
    %c0_0 = arith.constant 0 : index
    %0 = vector.load %arg1[%c0, %c0_0] : memref<32x128xf32, #tpu.memory_space<vmem>>, vector<32x128xf32>
    %c0_1 = arith.constant 0 : index
    %c0_2 = arith.constant 0 : index
    %1 = vector.load %arg2[%c0_1, %c0_2] : memref<1x128xf32, #tpu.memory_space<vmem>>, vector<1x128xf32>
    %2 = vector.broadcast %1 : vector<1x128xf32> to vector<32x128xf32>
    %3 = arith.mulf %0, %2 : vector<32x128xf32>
    %c0_3 = arith.constant 0 : index
    %c0_4 = arith.constant 0 : index
    %4 = vector.load %arg3[%c0_3, %c0_4] : memref<1x128xf32, #tpu.memory_space<vmem>>, vector<1x128xf32>
    %5 = vector.broadcast %4 : vector<1x128xf32> to vector<32x128xf32>
    %6 = arith.addf %3, %5 : vector<32x128xf32>
    %cst = arith.constant 0.000000e+00 : f32
    %7 = vector.broadcast %cst : f32 to vector<32x128xf32>
    %8 = arith.maximumf %6, %7 : vector<32x128xf32>
    %c0_5 = arith.constant 0 : index
    %c0_6 = arith.constant 0 : index
    %9 = vector.load %arg4[%c0_5, %c0_6] : memref<128x128xf32, #tpu.memory_space<vmem>>, vector<128x128xf32>
    %cst_7 = arith.constant dense<0.000000e+00> : vector<32x128xf32>
    %10 = tpu.matmul %8, %9, %cst_7 {dimension_numbers = #tpu.dot_dimension_numbers<[1], [0], [0], [1], [0, 0, 1, 1], [], []>} : vector<32x128xf32>, vector<128x128xf32>, vector<32x128xf32> -> vector<32x128xf32>
    %c0_8 = arith.constant 0 : index
    %c0_9 = arith.constant 0 : index
    %11 = vector.load %arg5[%c0_8, %c0_9] : memref<32x128xf32, #tpu.memory_space<vmem>>, vector<32x128xf32>
    tpu.vector_store %arg5[%c0_8, %c0_9], %10 {strides = array<i32>} : memref<32x128xf32, #tpu.memory_space<vmem>>, vector<32x128xf32>,
    %12 = tpu.iota {dimensions = array<i32: 0>} : vector<32x128xi32>
    %c32_i32 = arith.constant 32 : i32
    %13 = arith.muli %arg0, %c32_i32 : i32
    %14 = vector.broadcast %13 : i32 to vector<32x128xi32>
    %15 = arith.addi %12, %14 : vector<32x128xi32>
    %c32_i32_10 = arith.constant 32 : i32
    %16 = vector.broadcast %c32_i32_10 : i32 to vector<32x128xi32>
    %17 = arith.cmpi slt, %15, %16 : vector<32x128xi32>
    %18 = arith.extui %17 : vector<32x128xi1> to vector<32x128xi32>
    %19 = arith.sitofp %18 : vector<32x128xi32> to vector<32x128xf32>
    %20 = arith.mulf %10, %19 : vector<32x128xf32>
    %cst_11 = arith.constant dense<0.000000e+00> : vector<128xf32>
    %21 = vector.multi_reduction <add>, %20, %cst_11 [0] : vector<32x128xf32> to vector<128xf32>
    %22 = vector.shape_cast %21 : vector<128xf32> to vector<1x128xf32>
    %c0_12 = arith.constant 0 : index
    %c0_13 = arith.constant 0 : index
    %c0_14 = arith.constant 0 : index
    %23 = vector.load %arg6[%c0_12, %c0_13, %c0_14] : memref<1x1x128xf32, #tpu.memory_space<vmem>>, vector<1x1x128xf32>
    %24 = vector.shape_cast %23 : vector<1x1x128xf32> to vector<1x128xf32>
    %25 = vector.shape_cast %22 : vector<1x128xf32> to vector<1x1x128xf32>
    tpu.vector_store %arg6[%c0_12, %c0_13, %c0_14], %25 {strides = array<i32>} : memref<1x1x128xf32, #tpu.memory_space<vmem>>, vector<1x1x128xf32>,
    %26 = arith.mulf %20, %20 : vector<32x128xf32>
    %cst_15 = arith.constant dense<0.000000e+00> : vector<128xf32>
    %27 = vector.multi_reduction <add>, %26, %cst_15 [0] : vector<32x128xf32> to vector<128xf32>
    %28 = vector.shape_cast %27 : vector<128xf32> to vector<1x128xf32>
    %c0_16 = arith.constant 0 : index
    %c0_17 = arith.constant 0 : index
    %c0_18 = arith.constant 0 : index
    %29 = vector.load %arg7[%c0_16, %c0_17, %c0_18] : memref<1x1x128xf32, #tpu.memory_space<vmem>>, vector<1x1x128xf32>
    %30 = vector.shape_cast %29 : vector<1x1x128xf32> to vector<1x128xf32>
    %31 = vector.shape_cast %28 : vector<1x128xf32> to vector<1x1x128xf32>
    tpu.vector_store %arg7[%c0_16, %c0_17, %c0_18], %31 {strides = array<i32>} : memref<1x1x128xf32, #tpu.memory_space<vmem>>, vector<1x1x128xf32>,
    return
  }
  func.func @transform_0(%arg0: i32) -> (i32, i32) {
    %c0_i32 = arith.constant 0 : i32
    %c0_i32_0 = arith.constant 0 : i32
    return %arg0, %c0_i32 : i32, i32
  }
  func.func @transform_1(%arg0: i32) -> (i32, i32) {
    %c0_i32 = arith.constant 0 : i32
    %c0_i32_0 = arith.constant 0 : i32
    %c0_i32_1 = arith.constant 0 : i32
    return %c0_i32, %c0_i32_0 : i32, i32
  }
  func.func @transform_2(%arg0: i32) -> (i32, i32) {
    %c0_i32 = arith.constant 0 : i32
    %c0_i32_0 = arith.constant 0 : i32
    %c0_i32_1 = arith.constant 0 : i32
    return %c0_i32, %c0_i32_0 : i32, i32
  }
  func.func @transform_3(%arg0: i32) -> (i32, i32) {
    %c0_i32 = arith.constant 0 : i32
    %c0_i32_0 = arith.constant 0 : i32
    %c0_i32_1 = arith.constant 0 : i32
    return %c0_i32, %c0_i32_0 : i32, i32
  }
  func.func @transform_4(%arg0: i32) -> (i32, i32) {
    %c0_i32 = arith.constant 0 : i32
    %c0_i32_0 = arith.constant 0 : i32
    return %arg0, %c0_i32 : i32, i32
  }
  func.func @transform_5(%arg0: i32) -> (i32, i32, i32) {
    %c0_i32 = arith.constant 0 : i32
    %c0_i32_0 = arith.constant 0 : i32
    %c0_i32_1 = arith.constant 0 : i32
    return %arg0, %c0_i32, %c0_i32_0 : i32, i32, i32
  }
  func.func @transform_6(%arg0: i32) -> (i32, i32, i32) {
    %c0_i32 = arith.constant 0 : i32
    %c0_i32_0 = arith.constant 0 : i32
    %c0_i32_1 = arith.constant 0 : i32
    return %arg0, %c0_i32, %c0_i32_0 : i32, i32, i32
  }
}

module attributes {stable_mosaic.version = 11 : i64} {
  func.func @_residual_bn_relu_kernel(%arg0: i32, %arg1: memref<1x16x128xf32, #tpu.memory_space<vmem>>, %arg2: memref<1x16x128xf32, #tpu.memory_space<vmem>>, %arg3: memref<1x128xf32, #tpu.memory_space<vmem>>, %arg4: memref<1x128xf32, #tpu.memory_space<vmem>>, %arg5: memref<1x16x128xf32, #tpu.memory_space<vmem>>) attributes {dimension_semantics = [#tpu.dimension_semantics<parallel>], iteration_bounds = array<i64: 2>, scalar_prefetch = 0 : i64, scratch_operands = 0 : i64, tpu.core_type = #tpu.core_type<tc>, window_params = [{transform_indices = @transform_0, window_bounds = array<i64: 1, 16, 128>}, {transform_indices = @transform_1, window_bounds = array<i64: 1, 16, 128>}, {pipeline_mode = #tpu.pipeline_mode<synchronous>, transform_indices = @transform_2, window_bounds = array<i64: 1, 128>}, {pipeline_mode = #tpu.pipeline_mode<synchronous>, transform_indices = @transform_3, window_bounds = array<i64: 1, 128>}, {transform_indices = @transform_4, window_bounds = array<i64: 1, 16, 128>}]} {
    %c0 = arith.constant 0 : index
    %c0_0 = arith.constant 0 : index
    %c0_1 = arith.constant 0 : index
    %0 = vector.load %arg1[%c0, %c0_0, %c0_1] : memref<1x16x128xf32, #tpu.memory_space<vmem>>, vector<1x16x128xf32>
    %1 = vector.shape_cast %0 : vector<1x16x128xf32> to vector<16x128xf32>
    %c0_2 = arith.constant 0 : index
    %c0_3 = arith.constant 0 : index
    %c0_4 = arith.constant 0 : index
    %2 = vector.load %arg2[%c0_2, %c0_3, %c0_4] : memref<1x16x128xf32, #tpu.memory_space<vmem>>, vector<1x16x128xf32>
    %3 = vector.shape_cast %2 : vector<1x16x128xf32> to vector<16x128xf32>
    %c0_5 = arith.constant 0 : index
    %c0_6 = arith.constant 0 : index
    %4 = vector.load %arg3[%c0_5, %c0_6] : memref<1x128xf32, #tpu.memory_space<vmem>>, vector<1x128xf32>
    %5 = vector.broadcast %4 : vector<1x128xf32> to vector<16x128xf32>
    %6 = arith.mulf %3, %5 : vector<16x128xf32>
    %c0_7 = arith.constant 0 : index
    %c0_8 = arith.constant 0 : index
    %7 = vector.load %arg4[%c0_7, %c0_8] : memref<1x128xf32, #tpu.memory_space<vmem>>, vector<1x128xf32>
    %8 = vector.broadcast %7 : vector<1x128xf32> to vector<16x128xf32>
    %9 = arith.addf %6, %8 : vector<16x128xf32>
    %cst = arith.constant 0.000000e+00 : f32
    %10 = vector.broadcast %cst : f32 to vector<16x128xf32>
    %11 = arith.maximumf %9, %10 : vector<16x128xf32>
    %12 = arith.addf %1, %11 : vector<16x128xf32>
    %c0_9 = arith.constant 0 : index
    %c0_10 = arith.constant 0 : index
    %c0_11 = arith.constant 0 : index
    %13 = vector.load %arg5[%c0_9, %c0_10, %c0_11] : memref<1x16x128xf32, #tpu.memory_space<vmem>>, vector<1x16x128xf32>
    %14 = vector.shape_cast %13 : vector<1x16x128xf32> to vector<16x128xf32>
    %15 = vector.shape_cast %12 : vector<16x128xf32> to vector<1x16x128xf32>
    tpu.vector_store %arg5[%c0_9, %c0_10, %c0_11], %15 {strides = array<i32>} : memref<1x16x128xf32, #tpu.memory_space<vmem>>, vector<1x16x128xf32>,
    return
  }
  func.func @transform_0(%arg0: i32) -> (i32, i32, i32) {
    %c0_i32 = arith.constant 0 : i32
    %c0_i32_0 = arith.constant 0 : i32
    %c0_i32_1 = arith.constant 0 : i32
    return %arg0, %c0_i32, %c0_i32_0 : i32, i32, i32
  }
  func.func @transform_1(%arg0: i32) -> (i32, i32, i32) {
    %c0_i32 = arith.constant 0 : i32
    %c0_i32_0 = arith.constant 0 : i32
    %c0_i32_1 = arith.constant 0 : i32
    return %arg0, %c0_i32, %c0_i32_0 : i32, i32, i32
  }
  func.func @transform_2(%arg0: i32) -> (i32, i32) {
    %c0_i32 = arith.constant 0 : i32
    %c0_i32_0 = arith.constant 0 : i32
    %c0_i32_1 = arith.constant 0 : i32
    return %c0_i32, %c0_i32_0 : i32, i32
  }
  func.func @transform_3(%arg0: i32) -> (i32, i32) {
    %c0_i32 = arith.constant 0 : i32
    %c0_i32_0 = arith.constant 0 : i32
    %c0_i32_1 = arith.constant 0 : i32
    return %c0_i32, %c0_i32_0 : i32, i32
  }
  func.func @transform_4(%arg0: i32) -> (i32, i32, i32) {
    %c0_i32 = arith.constant 0 : i32
    %c0_i32_0 = arith.constant 0 : i32
    %c0_i32_1 = arith.constant 0 : i32
    return %arg0, %c0_i32, %c0_i32_0 : i32, i32, i32
  }
}

module attributes {stable_mosaic.version = 11 : i64} {
  func.func @_sa_core_kernel(%arg0: i32, %arg1: memref<1x16x128xf32, #tpu.memory_space<vmem>>, %arg2: memref<1x128xf32, #tpu.memory_space<vmem>>, %arg3: memref<1x128xf32, #tpu.memory_space<vmem>>, %arg4: memref<128x128xf32, #tpu.memory_space<vmem>>, %arg5: memref<128x128xf32, #tpu.memory_space<vmem>>, %arg6: memref<1x128xf32, #tpu.memory_space<vmem>>, %arg7: memref<128x128xf32, #tpu.memory_space<vmem>>, %arg8: memref<1x128xf32, #tpu.memory_space<vmem>>, %arg9: memref<1x16x128xf32, #tpu.memory_space<vmem>>, %arg10: memref<1x16x128xf32, #tpu.memory_space<vmem>>, %arg11: memref<1x1x128xf32, #tpu.memory_space<vmem>>, %arg12: memref<1x1x128xf32, #tpu.memory_space<vmem>>) attributes {dimension_semantics = [#tpu.dimension_semantics<parallel>], iteration_bounds = array<i64: 2>, scalar_prefetch = 0 : i64, scratch_operands = 0 : i64, tpu.core_type = #tpu.core_type<tc>, window_params = [{transform_indices = @transform_0, window_bounds = array<i64: 1, 16, 128>}, {pipeline_mode = #tpu.pipeline_mode<synchronous>, transform_indices = @transform_1, window_bounds = array<i64: 1, 128>}, {pipeline_mode = #tpu.pipeline_mode<synchronous>, transform_indices = @transform_2, window_bounds = array<i64: 1, 128>}, {pipeline_mode = #tpu.pipeline_mode<synchronous>, transform_indices = @transform_3, window_bounds = array<i64: 128, 128>}, {pipeline_mode = #tpu.pipeline_mode<synchronous>, transform_indices = @transform_4, window_bounds = array<i64: 128, 128>}, {pipeline_mode = #tpu.pipeline_mode<synchronous>, transform_indices = @transform_5, window_bounds = array<i64: 1, 128>}, {pipeline_mode = #tpu.pipeline_mode<synchronous>, transform_indices = @transform_6, window_bounds = array<i64: 128, 128>}, {pipeline_mode = #tpu.pipeline_mode<synchronous>, transform_indices = @transform_7, window_bounds = array<i64: 1, 128>}, {transform_indices = @transform_8, window_bounds = array<i64: 1, 16, 128>}, {transform_indices = @transform_9, window_bounds = array<i64: 1, 16, 128>}, {transform_indices = @transform_10, window_bounds = array<i64: 1, 1, 128>}, {transform_indices = @transform_11, window_bounds = array<i64: 1, 1, 128>}]} {
    %c0 = arith.constant 0 : index
    %c0_0 = arith.constant 0 : index
    %c0_1 = arith.constant 0 : index
    %0 = vector.load %arg1[%c0, %c0_0, %c0_1] : memref<1x16x128xf32, #tpu.memory_space<vmem>>, vector<1x16x128xf32>
    %1 = vector.shape_cast %0 : vector<1x16x128xf32> to vector<16x128xf32>
    %c0_2 = arith.constant 0 : index
    %c0_3 = arith.constant 0 : index
    %2 = vector.load %arg2[%c0_2, %c0_3] : memref<1x128xf32, #tpu.memory_space<vmem>>, vector<1x128xf32>
    %3 = vector.broadcast %2 : vector<1x128xf32> to vector<16x128xf32>
    %4 = arith.mulf %1, %3 : vector<16x128xf32>
    %c0_4 = arith.constant 0 : index
    %c0_5 = arith.constant 0 : index
    %5 = vector.load %arg3[%c0_4, %c0_5] : memref<1x128xf32, #tpu.memory_space<vmem>>, vector<1x128xf32>
    %6 = vector.broadcast %5 : vector<1x128xf32> to vector<16x128xf32>
    %7 = arith.addf %4, %6 : vector<16x128xf32>
    %cst = arith.constant 0.000000e+00 : f32
    %8 = vector.broadcast %cst : f32 to vector<16x128xf32>
    %9 = arith.maximumf %7, %8 : vector<16x128xf32>
    %c0_6 = arith.constant 0 : index
    %c0_7 = arith.constant 0 : index
    %c0_8 = arith.constant 0 : index
    %10 = vector.load %arg9[%c0_6, %c0_7, %c0_8] : memref<1x16x128xf32, #tpu.memory_space<vmem>>, vector<1x16x128xf32>
    %11 = vector.shape_cast %10 : vector<1x16x128xf32> to vector<16x128xf32>
    %12 = vector.shape_cast %9 : vector<16x128xf32> to vector<1x16x128xf32>
    tpu.vector_store %arg9[%c0_6, %c0_7, %c0_8], %12 {strides = array<i32>} : memref<1x16x128xf32, #tpu.memory_space<vmem>>, vector<1x16x128xf32>,
    %c0_9 = arith.constant 0 : index
    %c0_10 = arith.constant 0 : index
    %13 = vector.load %arg4[%c0_9, %c0_10] : memref<128x128xf32, #tpu.memory_space<vmem>>, vector<128x128xf32>
    %cst_11 = arith.constant dense<0.000000e+00> : vector<16x128xf32>
    %14 = tpu.matmul %9, %13, %cst_11 {dimension_numbers = #tpu.dot_dimension_numbers<[1], [0], [0], [1], [0, 0, 1, 1], [], []>} : vector<16x128xf32>, vector<128x128xf32>, vector<16x128xf32> -> vector<16x128xf32>
    %c0_12 = arith.constant 0 : index
    %c0_13 = arith.constant 0 : index
    %15 = vector.load %arg5[%c0_12, %c0_13] : memref<128x128xf32, #tpu.memory_space<vmem>>, vector<128x128xf32>
    %cst_14 = arith.constant dense<0.000000e+00> : vector<16x128xf32>
    %16 = tpu.matmul %9, %15, %cst_14 {dimension_numbers = #tpu.dot_dimension_numbers<[1], [0], [0], [1], [0, 0, 1, 1], [], []>} : vector<16x128xf32>, vector<128x128xf32>, vector<16x128xf32> -> vector<16x128xf32>
    %c0_15 = arith.constant 0 : index
    %c0_16 = arith.constant 0 : index
    %17 = vector.load %arg6[%c0_15, %c0_16] : memref<1x128xf32, #tpu.memory_space<vmem>>, vector<1x128xf32>
    %18 = vector.broadcast %17 : vector<1x128xf32> to vector<16x128xf32>
    %19 = arith.addf %16, %18 : vector<16x128xf32>
    %cst_17 = arith.constant dense<0.000000e+00> : vector<16x16xf32>
    %20 = tpu.matmul %14, %14, %cst_17 {dimension_numbers = #tpu.dot_dimension_numbers<[1], [1], [0], [0], [0, 0, 1, 0], [], []>} : vector<16x128xf32>, vector<16x128xf32>, vector<16x16xf32> -> vector<16x16xf32>
    %cst_18 = arith.constant dense<0xFF800000> : vector<16xf32>
    %21 = vector.multi_reduction <maximumf>, %20, %cst_18 [1] : vector<16x16xf32> to vector<16xf32>
    %22 = vector.shape_cast %21 : vector<16xf32> to vector<16x1xf32>
    %23 = vector.broadcast %22 : vector<16x1xf32> to vector<16x16xf32>
    %24 = arith.subf %20, %23 : vector<16x16xf32>
    %25 = math.exp %24 : vector<16x16xf32>
    %cst_19 = arith.constant dense<0.000000e+00> : vector<16xf32>
    %26 = vector.multi_reduction <add>, %25, %cst_19 [1] : vector<16x16xf32> to vector<16xf32>
    %27 = vector.shape_cast %26 : vector<16xf32> to vector<16x1xf32>
    %28 = tpu.reciprocal %27 {approx = true} : vector<16x1xf32> -> vector<16x1xf32>
    %29 = vector.broadcast %28 : vector<16x1xf32> to vector<16x16xf32>
    %30 = arith.mulf %25, %29 : vector<16x16xf32>
    %cst_20 = arith.constant dense<0.000000e+00> : vector<16xf32>
    %31 = vector.multi_reduction <add>, %30, %cst_20 [0] : vector<16x16xf32> to vector<16xf32>
    %32 = vector.shape_cast %31 : vector<16xf32> to vector<1x16xf32>
    %cst_21 = arith.constant 9.99999971E-10 : f32
    %33 = vector.broadcast %cst_21 : f32 to vector<1x16xf32>
    %34 = arith.addf %33, %32 : vector<1x16xf32>
    %35 = tpu.reciprocal %34 {approx = true} : vector<1x16xf32> -> vector<1x16xf32>
    %36 = vector.broadcast %35 : vector<1x16xf32> to vector<16x16xf32>
    %37 = arith.mulf %30, %36 : vector<16x16xf32>
    %cst_22 = arith.constant dense<0.000000e+00> : vector<16x128xf32>
    %38 = tpu.matmul %37, %19, %cst_22 {dimension_numbers = #tpu.dot_dimension_numbers<[0], [0], [1], [1], [0, 1, 1, 1], [], []>} : vector<16x16xf32>, vector<16x128xf32>, vector<16x128xf32> -> vector<16x128xf32>
    %39 = arith.subf %9, %38 : vector<16x128xf32>
    %c0_23 = arith.constant 0 : index
    %c0_24 = arith.constant 0 : index
    %40 = vector.load %arg7[%c0_23, %c0_24] : memref<128x128xf32, #tpu.memory_space<vmem>>, vector<128x128xf32>
    %cst_25 = arith.constant dense<0.000000e+00> : vector<16x128xf32>
    %41 = tpu.matmul %39, %40, %cst_25 {dimension_numbers = #tpu.dot_dimension_numbers<[1], [0], [0], [1], [0, 0, 1, 1], [], []>} : vector<16x128xf32>, vector<128x128xf32>, vector<16x128xf32> -> vector<16x128xf32>
    %c0_26 = arith.constant 0 : index
    %c0_27 = arith.constant 0 : index
    %42 = vector.load %arg8[%c0_26, %c0_27] : memref<1x128xf32, #tpu.memory_space<vmem>>, vector<1x128xf32>
    %43 = vector.broadcast %42 : vector<1x128xf32> to vector<16x128xf32>
    %44 = arith.addf %41, %43 : vector<16x128xf32>
    %c0_28 = arith.constant 0 : index
    %c0_29 = arith.constant 0 : index
    %c0_30 = arith.constant 0 : index
    %45 = vector.load %arg10[%c0_28, %c0_29, %c0_30] : memref<1x16x128xf32, #tpu.memory_space<vmem>>, vector<1x16x128xf32>
    %46 = vector.shape_cast %45 : vector<1x16x128xf32> to vector<16x128xf32>
    %47 = vector.shape_cast %44 : vector<16x128xf32> to vector<1x16x128xf32>
    tpu.vector_store %arg10[%c0_28, %c0_29, %c0_30], %47 {strides = array<i32>} : memref<1x16x128xf32, #tpu.memory_space<vmem>>, vector<1x16x128xf32>,
    %cst_31 = arith.constant dense<0.000000e+00> : vector<128xf32>
    %48 = vector.multi_reduction <add>, %44, %cst_31 [0] : vector<16x128xf32> to vector<128xf32>
    %49 = vector.shape_cast %48 : vector<128xf32> to vector<1x128xf32>
    %c0_32 = arith.constant 0 : index
    %c0_33 = arith.constant 0 : index
    %c0_34 = arith.constant 0 : index
    %50 = vector.load %arg11[%c0_32, %c0_33, %c0_34] : memref<1x1x128xf32, #tpu.memory_space<vmem>>, vector<1x1x128xf32>
    %51 = vector.shape_cast %50 : vector<1x1x128xf32> to vector<1x128xf32>
    %52 = vector.shape_cast %49 : vector<1x128xf32> to vector<1x1x128xf32>
    tpu.vector_store %arg11[%c0_32, %c0_33, %c0_34], %52 {strides = array<i32>} : memref<1x1x128xf32, #tpu.memory_space<vmem>>, vector<1x1x128xf32>,
    %53 = arith.mulf %44, %44 : vector<16x128xf32>
    %cst_35 = arith.constant dense<0.000000e+00> : vector<128xf32>
    %54 = vector.multi_reduction <add>, %53, %cst_35 [0] : vector<16x128xf32> to vector<128xf32>
    %55 = vector.shape_cast %54 : vector<128xf32> to vector<1x128xf32>
    %c0_36 = arith.constant 0 : index
    %c0_37 = arith.constant 0 : index
    %c0_38 = arith.constant 0 : index
    %56 = vector.load %arg12[%c0_36, %c0_37, %c0_38] : memref<1x1x128xf32, #tpu.memory_space<vmem>>, vector<1x1x128xf32>
    %57 = vector.shape_cast %56 : vector<1x1x128xf32> to vector<1x128xf32>
    %58 = vector.shape_cast %55 : vector<1x128xf32> to vector<1x1x128xf32>
    tpu.vector_store %arg12[%c0_36, %c0_37, %c0_38], %58 {strides = array<i32>} : memref<1x1x128xf32, #tpu.memory_space<vmem>>, vector<1x1x128xf32>,
    return
  }
  func.func @transform_0(%arg0: i32) -> (i32, i32, i32) {
    %c0_i32 = arith.constant 0 : i32
    %c0_i32_0 = arith.constant 0 : i32
    %c0_i32_1 = arith.constant 0 : i32
    return %arg0, %c0_i32, %c0_i32_0 : i32, i32, i32
  }
  func.func @transform_1(%arg0: i32) -> (i32, i32) {
    %c0_i32 = arith.constant 0 : i32
    %c0_i32_0 = arith.constant 0 : i32
    %c0_i32_1 = arith.constant 0 : i32
    return %c0_i32, %c0_i32_0 : i32, i32
  }
  func.func @transform_2(%arg0: i32) -> (i32, i32) {
    %c0_i32 = arith.constant 0 : i32
    %c0_i32_0 = arith.constant 0 : i32
    %c0_i32_1 = arith.constant 0 : i32
    return %c0_i32, %c0_i32_0 : i32, i32
  }
  func.func @transform_3(%arg0: i32) -> (i32, i32) {
    %c0_i32 = arith.constant 0 : i32
    %c0_i32_0 = arith.constant 0 : i32
    %c0_i32_1 = arith.constant 0 : i32
    return %c0_i32, %c0_i32_0 : i32, i32
  }
  func.func @transform_4(%arg0: i32) -> (i32, i32) {
    %c0_i32 = arith.constant 0 : i32
    %c0_i32_0 = arith.constant 0 : i32
    %c0_i32_1 = arith.constant 0 : i32
    return %c0_i32, %c0_i32_0 : i32, i32
  }
  func.func @transform_5(%arg0: i32) -> (i32, i32) {
    %c0_i32 = arith.constant 0 : i32
    %c0_i32_0 = arith.constant 0 : i32
    %c0_i32_1 = arith.constant 0 : i32
    return %c0_i32, %c0_i32_0 : i32, i32
  }
  func.func @transform_6(%arg0: i32) -> (i32, i32) {
    %c0_i32 = arith.constant 0 : i32
    %c0_i32_0 = arith.constant 0 : i32
    %c0_i32_1 = arith.constant 0 : i32
    return %c0_i32, %c0_i32_0 : i32, i32
  }
  func.func @transform_7(%arg0: i32) -> (i32, i32) {
    %c0_i32 = arith.constant 0 : i32
    %c0_i32_0 = arith.constant 0 : i32
    %c0_i32_1 = arith.constant 0 : i32
    return %c0_i32, %c0_i32_0 : i32, i32
  }
  func.func @transform_8(%arg0: i32) -> (i32, i32, i32) {
    %c0_i32 = arith.constant 0 : i32
    %c0_i32_0 = arith.constant 0 : i32
    %c0_i32_1 = arith.constant 0 : i32
    return %arg0, %c0_i32, %c0_i32_0 : i32, i32, i32
  }
  func.func @transform_9(%arg0: i32) -> (i32, i32, i32) {
    %c0_i32 = arith.constant 0 : i32
    %c0_i32_0 = arith.constant 0 : i32
    %c0_i32_1 = arith.constant 0 : i32
    return %arg0, %c0_i32, %c0_i32_0 : i32, i32, i32
  }
  func.func @transform_10(%arg0: i32) -> (i32, i32, i32) {
    %c0_i32 = arith.constant 0 : i32
    %c0_i32_0 = arith.constant 0 : i32
    %c0_i32_1 = arith.constant 0 : i32
    return %arg0, %c0_i32, %c0_i32_0 : i32, i32, i32
  }
  func.func @transform_11(%arg0: i32) -> (i32, i32, i32) {
    %c0_i32 = arith.constant 0 : i32
    %c0_i32_0 = arith.constant 0 : i32
    %c0_i32_1 = arith.constant 0 : i32
    return %arg0, %c0_i32, %c0_i32_0 : i32, i32, i32
  }
}

module attributes {stable_mosaic.version = 11 : i64} {
  func.func @_sa_core_kernel(%arg0: i32, %arg1: memref<1x16x128xf32, #tpu.memory_space<vmem>>, %arg2: memref<1x16x128xf32, #tpu.memory_space<vmem>>, %arg3: memref<1x128xf32, #tpu.memory_space<vmem>>, %arg4: memref<1x128xf32, #tpu.memory_space<vmem>>, %arg5: memref<128x128xf32, #tpu.memory_space<vmem>>, %arg6: memref<128x128xf32, #tpu.memory_space<vmem>>, %arg7: memref<1x128xf32, #tpu.memory_space<vmem>>, %arg8: memref<128x128xf32, #tpu.memory_space<vmem>>, %arg9: memref<1x128xf32, #tpu.memory_space<vmem>>, %arg10: memref<1x16x128xf32, #tpu.memory_space<vmem>>, %arg11: memref<1x16x128xf32, #tpu.memory_space<vmem>>, %arg12: memref<1x1x128xf32, #tpu.memory_space<vmem>>, %arg13: memref<1x1x128xf32, #tpu.memory_space<vmem>>) attributes {dimension_semantics = [#tpu.dimension_semantics<parallel>], iteration_bounds = array<i64: 2>, scalar_prefetch = 0 : i64, scratch_operands = 0 : i64, tpu.core_type = #tpu.core_type<tc>, window_params = [{transform_indices = @transform_0, window_bounds = array<i64: 1, 16, 128>}, {transform_indices = @transform_1, window_bounds = array<i64: 1, 16, 128>}, {pipeline_mode = #tpu.pipeline_mode<synchronous>, transform_indices = @transform_2, window_bounds = array<i64: 1, 128>}, {pipeline_mode = #tpu.pipeline_mode<synchronous>, transform_indices = @transform_3, window_bounds = array<i64: 1, 128>}, {pipeline_mode = #tpu.pipeline_mode<synchronous>, transform_indices = @transform_4, window_bounds = array<i64: 128, 128>}, {pipeline_mode = #tpu.pipeline_mode<synchronous>, transform_indices = @transform_5, window_bounds = array<i64: 128, 128>}, {pipeline_mode = #tpu.pipeline_mode<synchronous>, transform_indices = @transform_6, window_bounds = array<i64: 1, 128>}, {pipeline_mode = #tpu.pipeline_mode<synchronous>, transform_indices = @transform_7, window_bounds = array<i64: 128, 128>}, {pipeline_mode = #tpu.pipeline_mode<synchronous>, transform_indices = @transform_8, window_bounds = array<i64: 1, 128>}, {transform_indices = @transform_9, window_bounds = array<i64: 1, 16, 128>}, {transform_indices = @transform_10, window_bounds = array<i64: 1, 16, 128>}, {transform_indices = @transform_11, window_bounds = array<i64: 1, 1, 128>}, {transform_indices = @transform_12, window_bounds = array<i64: 1, 1, 128>}]} {
    %c0 = arith.constant 0 : index
    %c0_0 = arith.constant 0 : index
    %c0_1 = arith.constant 0 : index
    %0 = vector.load %arg2[%c0, %c0_0, %c0_1] : memref<1x16x128xf32, #tpu.memory_space<vmem>>, vector<1x16x128xf32>
    %1 = vector.shape_cast %0 : vector<1x16x128xf32> to vector<16x128xf32>
    %c0_2 = arith.constant 0 : index
    %c0_3 = arith.constant 0 : index
    %2 = vector.load %arg3[%c0_2, %c0_3] : memref<1x128xf32, #tpu.memory_space<vmem>>, vector<1x128xf32>
    %3 = vector.broadcast %2 : vector<1x128xf32> to vector<16x128xf32>
    %4 = arith.mulf %1, %3 : vector<16x128xf32>
    %c0_4 = arith.constant 0 : index
    %c0_5 = arith.constant 0 : index
    %5 = vector.load %arg4[%c0_4, %c0_5] : memref<1x128xf32, #tpu.memory_space<vmem>>, vector<1x128xf32>
    %6 = vector.broadcast %5 : vector<1x128xf32> to vector<16x128xf32>
    %7 = arith.addf %4, %6 : vector<16x128xf32>
    %cst = arith.constant 0.000000e+00 : f32
    %8 = vector.broadcast %cst : f32 to vector<16x128xf32>
    %9 = arith.maximumf %7, %8 : vector<16x128xf32>
    %c0_6 = arith.constant 0 : index
    %c0_7 = arith.constant 0 : index
    %c0_8 = arith.constant 0 : index
    %10 = vector.load %arg1[%c0_6, %c0_7, %c0_8] : memref<1x16x128xf32, #tpu.memory_space<vmem>>, vector<1x16x128xf32>
    %11 = vector.shape_cast %10 : vector<1x16x128xf32> to vector<16x128xf32>
    %12 = arith.addf %11, %9 : vector<16x128xf32>
    %c0_9 = arith.constant 0 : index
    %c0_10 = arith.constant 0 : index
    %c0_11 = arith.constant 0 : index
    %13 = vector.load %arg10[%c0_9, %c0_10, %c0_11] : memref<1x16x128xf32, #tpu.memory_space<vmem>>, vector<1x16x128xf32>
    %14 = vector.shape_cast %13 : vector<1x16x128xf32> to vector<16x128xf32>
    %15 = vector.shape_cast %12 : vector<16x128xf32> to vector<1x16x128xf32>
    tpu.vector_store %arg10[%c0_9, %c0_10, %c0_11], %15 {strides = array<i32>} : memref<1x16x128xf32, #tpu.memory_space<vmem>>, vector<1x16x128xf32>,
    %c0_12 = arith.constant 0 : index
    %c0_13 = arith.constant 0 : index
    %16 = vector.load %arg5[%c0_12, %c0_13] : memref<128x128xf32, #tpu.memory_space<vmem>>, vector<128x128xf32>
    %cst_14 = arith.constant dense<0.000000e+00> : vector<16x128xf32>
    %17 = tpu.matmul %12, %16, %cst_14 {dimension_numbers = #tpu.dot_dimension_numbers<[1], [0], [0], [1], [0, 0, 1, 1], [], []>} : vector<16x128xf32>, vector<128x128xf32>, vector<16x128xf32> -> vector<16x128xf32>
    %c0_15 = arith.constant 0 : index
    %c0_16 = arith.constant 0 : index
    %18 = vector.load %arg6[%c0_15, %c0_16] : memref<128x128xf32, #tpu.memory_space<vmem>>, vector<128x128xf32>
    %cst_17 = arith.constant dense<0.000000e+00> : vector<16x128xf32>
    %19 = tpu.matmul %12, %18, %cst_17 {dimension_numbers = #tpu.dot_dimension_numbers<[1], [0], [0], [1], [0, 0, 1, 1], [], []>} : vector<16x128xf32>, vector<128x128xf32>, vector<16x128xf32> -> vector<16x128xf32>
    %c0_18 = arith.constant 0 : index
    %c0_19 = arith.constant 0 : index
    %20 = vector.load %arg7[%c0_18, %c0_19] : memref<1x128xf32, #tpu.memory_space<vmem>>, vector<1x128xf32>
    %21 = vector.broadcast %20 : vector<1x128xf32> to vector<16x128xf32>
    %22 = arith.addf %19, %21 : vector<16x128xf32>
    %cst_20 = arith.constant dense<0.000000e+00> : vector<16x16xf32>
    %23 = tpu.matmul %17, %17, %cst_20 {dimension_numbers = #tpu.dot_dimension_numbers<[1], [1], [0], [0], [0, 0, 1, 0], [], []>} : vector<16x128xf32>, vector<16x128xf32>, vector<16x16xf32> -> vector<16x16xf32>
    %cst_21 = arith.constant dense<0xFF800000> : vector<16xf32>
    %24 = vector.multi_reduction <maximumf>, %23, %cst_21 [1] : vector<16x16xf32> to vector<16xf32>
    %25 = vector.shape_cast %24 : vector<16xf32> to vector<16x1xf32>
    %26 = vector.broadcast %25 : vector<16x1xf32> to vector<16x16xf32>
    %27 = arith.subf %23, %26 : vector<16x16xf32>
    %28 = math.exp %27 : vector<16x16xf32>
    %cst_22 = arith.constant dense<0.000000e+00> : vector<16xf32>
    %29 = vector.multi_reduction <add>, %28, %cst_22 [1] : vector<16x16xf32> to vector<16xf32>
    %30 = vector.shape_cast %29 : vector<16xf32> to vector<16x1xf32>
    %31 = tpu.reciprocal %30 {approx = true} : vector<16x1xf32> -> vector<16x1xf32>
    %32 = vector.broadcast %31 : vector<16x1xf32> to vector<16x16xf32>
    %33 = arith.mulf %28, %32 : vector<16x16xf32>
    %cst_23 = arith.constant dense<0.000000e+00> : vector<16xf32>
    %34 = vector.multi_reduction <add>, %33, %cst_23 [0] : vector<16x16xf32> to vector<16xf32>
    %35 = vector.shape_cast %34 : vector<16xf32> to vector<1x16xf32>
    %cst_24 = arith.constant 9.99999971E-10 : f32
    %36 = vector.broadcast %cst_24 : f32 to vector<1x16xf32>
    %37 = arith.addf %36, %35 : vector<1x16xf32>
    %38 = tpu.reciprocal %37 {approx = true} : vector<1x16xf32> -> vector<1x16xf32>
    %39 = vector.broadcast %38 : vector<1x16xf32> to vector<16x16xf32>
    %40 = arith.mulf %33, %39 : vector<16x16xf32>
    %cst_25 = arith.constant dense<0.000000e+00> : vector<16x128xf32>
    %41 = tpu.matmul %40, %22, %cst_25 {dimension_numbers = #tpu.dot_dimension_numbers<[0], [0], [1], [1], [0, 1, 1, 1], [], []>} : vector<16x16xf32>, vector<16x128xf32>, vector<16x128xf32> -> vector<16x128xf32>
    %42 = arith.subf %12, %41 : vector<16x128xf32>
    %c0_26 = arith.constant 0 : index
    %c0_27 = arith.constant 0 : index
    %43 = vector.load %arg8[%c0_26, %c0_27] : memref<128x128xf32, #tpu.memory_space<vmem>>, vector<128x128xf32>
    %cst_28 = arith.constant dense<0.000000e+00> : vector<16x128xf32>
    %44 = tpu.matmul %42, %43, %cst_28 {dimension_numbers = #tpu.dot_dimension_numbers<[1], [0], [0], [1], [0, 0, 1, 1], [], []>} : vector<16x128xf32>, vector<128x128xf32>, vector<16x128xf32> -> vector<16x128xf32>
    %c0_29 = arith.constant 0 : index
    %c0_30 = arith.constant 0 : index
    %45 = vector.load %arg9[%c0_29, %c0_30] : memref<1x128xf32, #tpu.memory_space<vmem>>, vector<1x128xf32>
    %46 = vector.broadcast %45 : vector<1x128xf32> to vector<16x128xf32>
    %47 = arith.addf %44, %46 : vector<16x128xf32>
    %c0_31 = arith.constant 0 : index
    %c0_32 = arith.constant 0 : index
    %c0_33 = arith.constant 0 : index
    %48 = vector.load %arg11[%c0_31, %c0_32, %c0_33] : memref<1x16x128xf32, #tpu.memory_space<vmem>>, vector<1x16x128xf32>
    %49 = vector.shape_cast %48 : vector<1x16x128xf32> to vector<16x128xf32>
    %50 = vector.shape_cast %47 : vector<16x128xf32> to vector<1x16x128xf32>
    tpu.vector_store %arg11[%c0_31, %c0_32, %c0_33], %50 {strides = array<i32>} : memref<1x16x128xf32, #tpu.memory_space<vmem>>, vector<1x16x128xf32>,
    %cst_34 = arith.constant dense<0.000000e+00> : vector<128xf32>
    %51 = vector.multi_reduction <add>, %47, %cst_34 [0] : vector<16x128xf32> to vector<128xf32>
    %52 = vector.shape_cast %51 : vector<128xf32> to vector<1x128xf32>
    %c0_35 = arith.constant 0 : index
    %c0_36 = arith.constant 0 : index
    %c0_37 = arith.constant 0 : index
    %53 = vector.load %arg12[%c0_35, %c0_36, %c0_37] : memref<1x1x128xf32, #tpu.memory_space<vmem>>, vector<1x1x128xf32>
    %54 = vector.shape_cast %53 : vector<1x1x128xf32> to vector<1x128xf32>
    %55 = vector.shape_cast %52 : vector<1x128xf32> to vector<1x1x128xf32>
    tpu.vector_store %arg12[%c0_35, %c0_36, %c0_37], %55 {strides = array<i32>} : memref<1x1x128xf32, #tpu.memory_space<vmem>>, vector<1x1x128xf32>,
    %56 = arith.mulf %47, %47 : vector<16x128xf32>
    %cst_38 = arith.constant dense<0.000000e+00> : vector<128xf32>
    %57 = vector.multi_reduction <add>, %56, %cst_38 [0] : vector<16x128xf32> to vector<128xf32>
    %58 = vector.shape_cast %57 : vector<128xf32> to vector<1x128xf32>
    %c0_39 = arith.constant 0 : index
    %c0_40 = arith.constant 0 : index
    %c0_41 = arith.constant 0 : index
    %59 = vector.load %arg13[%c0_39, %c0_40, %c0_41] : memref<1x1x128xf32, #tpu.memory_space<vmem>>, vector<1x1x128xf32>
    %60 = vector.shape_cast %59 : vector<1x1x128xf32> to vector<1x128xf32>
    %61 = vector.shape_cast %58 : vector<1x128xf32> to vector<1x1x128xf32>
    tpu.vector_store %arg13[%c0_39, %c0_40, %c0_41], %61 {strides = array<i32>} : memref<1x1x128xf32, #tpu.memory_space<vmem>>, vector<1x1x128xf32>,
    return
  }
  func.func @transform_0(%arg0: i32) -> (i32, i32, i32) {
    %c0_i32 = arith.constant 0 : i32
    %c0_i32_0 = arith.constant 0 : i32
    %c0_i32_1 = arith.constant 0 : i32
    return %arg0, %c0_i32, %c0_i32_0 : i32, i32, i32
  }
  func.func @transform_1(%arg0: i32) -> (i32, i32, i32) {
    %c0_i32 = arith.constant 0 : i32
    %c0_i32_0 = arith.constant 0 : i32
    %c0_i32_1 = arith.constant 0 : i32
    return %arg0, %c0_i32, %c0_i32_0 : i32, i32, i32
  }
  func.func @transform_2(%arg0: i32) -> (i32, i32) {
    %c0_i32 = arith.constant 0 : i32
    %c0_i32_0 = arith.constant 0 : i32
    %c0_i32_1 = arith.constant 0 : i32
    return %c0_i32, %c0_i32_0 : i32, i32
  }
  func.func @transform_3(%arg0: i32) -> (i32, i32) {
    %c0_i32 = arith.constant 0 : i32
    %c0_i32_0 = arith.constant 0 : i32
    %c0_i32_1 = arith.constant 0 : i32
    return %c0_i32, %c0_i32_0 : i32, i32
  }
  func.func @transform_4(%arg0: i32) -> (i32, i32) {
    %c0_i32 = arith.constant 0 : i32
    %c0_i32_0 = arith.constant 0 : i32
    %c0_i32_1 = arith.constant 0 : i32
    return %c0_i32, %c0_i32_0 : i32, i32
  }
  func.func @transform_5(%arg0: i32) -> (i32, i32) {
    %c0_i32 = arith.constant 0 : i32
    %c0_i32_0 = arith.constant 0 : i32
    %c0_i32_1 = arith.constant 0 : i32
    return %c0_i32, %c0_i32_0 : i32, i32
  }
  func.func @transform_6(%arg0: i32) -> (i32, i32) {
    %c0_i32 = arith.constant 0 : i32
    %c0_i32_0 = arith.constant 0 : i32
    %c0_i32_1 = arith.constant 0 : i32
    return %c0_i32, %c0_i32_0 : i32, i32
  }
  func.func @transform_7(%arg0: i32) -> (i32, i32) {
    %c0_i32 = arith.constant 0 : i32
    %c0_i32_0 = arith.constant 0 : i32
    %c0_i32_1 = arith.constant 0 : i32
    return %c0_i32, %c0_i32_0 : i32, i32
  }
  func.func @transform_8(%arg0: i32) -> (i32, i32) {
    %c0_i32 = arith.constant 0 : i32
    %c0_i32_0 = arith.constant 0 : i32
    %c0_i32_1 = arith.constant 0 : i32
    return %c0_i32, %c0_i32_0 : i32, i32
  }
  func.func @transform_9(%arg0: i32) -> (i32, i32, i32) {
    %c0_i32 = arith.constant 0 : i32
    %c0_i32_0 = arith.constant 0 : i32
    %c0_i32_1 = arith.constant 0 : i32
    return %arg0, %c0_i32, %c0_i32_0 : i32, i32, i32
  }
  func.func @transform_10(%arg0: i32) -> (i32, i32, i32) {
    %c0_i32 = arith.constant 0 : i32
    %c0_i32_0 = arith.constant 0 : i32
    %c0_i32_1 = arith.constant 0 : i32
    return %arg0, %c0_i32, %c0_i32_0 : i32, i32, i32
  }
  func.func @transform_11(%arg0: i32) -> (i32, i32, i32) {
    %c0_i32 = arith.constant 0 : i32
    %c0_i32_0 = arith.constant 0 : i32
    %c0_i32_1 = arith.constant 0 : i32
    return %arg0, %c0_i32, %c0_i32_0 : i32, i32, i32
  }
  func.func @transform_12(%arg0: i32) -> (i32, i32, i32) {
    %c0_i32 = arith.constant 0 : i32
    %c0_i32_0 = arith.constant 0 : i32
    %c0_i32_1 = arith.constant 0 : i32
    return %arg0, %c0_i32, %c0_i32_0 : i32, i32, i32
  }
}

</mosaic_0001>

<bundles_post_ra>
// kernel: custom-call.8
= control target key start
LH: loop header
LB: loop body
LE: loop exit
PB: predicated region body
PF: predicated region fallthrough
CT: control target
= control target key end

     0   :  { %s6_s0 = inlined_call_operand.vmem [shape: f32[2,64], index: 0, kind: output, shape index: {}]  }

// kernel: fwd.5
= control target key start
LH: loop header
LB: loop body
LE: loop exit
PB: predicated region body
PF: predicated region fallthrough
CT: control target
= control target key end

     0   :  { %s254_s1 = inlined_call_operand.vmem [shape: f32[128,128], index: 1, kind: input, shape index: {}]   ;;  %s255_s0 = inlined_call_operand.vmem [shape: f32[32,128], index: 0, kind: input, shape index: {}]   ;;  %s256_s2 = inlined_call_operand.vmem [shape: f32[32,128], index: 2, kind: output, shape index: {0}]   ;;  %s257_s3 = inlined_call_operand.vmem [shape: f32[1,1,128], index: 3, kind: output, shape index: {1}]   ;;  %s258_s4 = inlined_call_operand.vmem [shape: f32[1,1,128], index: 4, kind: output, shape index: {2}]  }
   0x1   :  { %v33_v0 = vld [vmem:[%s254_s1 + $0x78] sm:$0xff]  ;;  %v32_v1 = vld [vmem:[%s254_s1 + $0x70] sm:$0xff]  ;;  %v31_v2 = vld [vmem:[%s254_s1 + $0x68] sm:$0xff] }
   0x2   :  { %104 = vmatpush.msra.mxu2 %v33_v0  ;;  %105 = vmatpush.msra.mxu3 %v33_v0  ;;  %v30_v3 = vld [vmem:[%s254_s1 + $0x60] sm:$0xff]  ;;  %v29_v4 = vld [vmem:[%s254_s1 + $0x58] sm:$0xff]  ;;  %v28_v5 = vld [vmem:[%s254_s1 + $0x50] sm:$0xff] }
   0x3   :  { %34 = vmatpush.msra.mxu0 %v33_v0  ;;  %103 = vmatpush.msra.mxu1 %v33_v0  ;;  %v27_v6 = vld [vmem:[%s254_s1 + $0x48] sm:$0xff]  ;;  %v26_v7 = vld [vmem:[%s254_s1 + $0x40] sm:$0xff]  ;;  %v25_v8 = vld [vmem:[%s254_s1 + $0x38] sm:$0xff] }
   0x4   :  { %107 = vmatpush.msra.mxu2 %v32_v1  ;;  %108 = vmatpush.msra.mxu3 %v32_v1  ;;  %v24_v9 = vld [vmem:[%s254_s1 + $0x30] sm:$0xff]  ;;  %v23_v10 = vld [vmem:[%s254_s1 + $0x28] sm:$0xff]  ;;  %v22_v11 = vld [vmem:[%s254_s1 + $0x20] sm:$0xff] }
   0x5   :  { %35 = vmatpush.msra.mxu0 %v32_v1  ;;  %106 = vmatpush.msra.mxu1 %v32_v1  ;;  %v21_v12 = vld [vmem:[%s254_s1 + $0x18] sm:$0xff]  ;;  %v20_v13 = vld [vmem:[%s254_s1 + $0x10] sm:$0xff]  ;;  %v19_v14 = vld [vmem:[%s254_s1 + $0x8] sm:$0xff] }
   0x6   :  { %110 = vmatpush.msra.mxu2 %v31_v2  ;;  %111 = vmatpush.msra.mxu3 %v31_v2  ;;  %v18_v15 = vld [vmem:[%s254_s1] sm:$0xff]  ;;  %v16_v16 = vld [vmem:[%s255_s0 + $0x10] sm:$0xff]  ;;  %v17_v17 = vld [vmem:[%s255_s0 + $0x18] sm:$0xff] }
   0x7   :  { %36 = vmatpush.msra.mxu0 %v31_v2  ;;  %109 = vmatpush.msra.mxu1 %v31_v2  ;;  %v14_v18 = vld [vmem:[%s255_s0] sm:$0xff]  ;;  %v15_v19 = vld [vmem:[%s255_s0 + $0x8] sm:$0xff] }
   0x8   :  { %113 = vmatpush.msra.mxu2 %v30_v3  ;;  %114 = vmatpush.msra.mxu3 %v30_v3 }
   0x9   :  { %37 = vmatpush.msra.mxu0 %v30_v3  ;;  %112 = vmatpush.msra.mxu1 %v30_v3 }
   0xa   :  { %116 = vmatpush.msra.mxu2 %v29_v4  ;;  %117 = vmatpush.msra.mxu3 %v29_v4 }
   0xb   :  { %38 = vmatpush.msra.mxu0 %v29_v4  ;;  %115 = vmatpush.msra.mxu1 %v29_v4 }
   0xc   :  { %119 = vmatpush.msra.mxu2 %v28_v5  ;;  %120 = vmatpush.msra.mxu3 %v28_v5 }
   0xd   :  { %39 = vmatpush.msra.mxu0 %v28_v5  ;;  %118 = vmatpush.msra.mxu1 %v28_v5 }
   0xe   :  { %122 = vmatpush.msra.mxu2 %v27_v6  ;;  %123 = vmatpush.msra.mxu3 %v27_v6 }
   0xf   :  { %40 = vmatpush.msra.mxu0 %v27_v6  ;;  %121 = vmatpush.msra.mxu1 %v27_v6 }
  0x10   :  { %125 = vmatpush.msra.mxu2 %v26_v7  ;;  %126 = vmatpush.msra.mxu3 %v26_v7 }
  0x11   :  { %41 = vmatpush.msra.mxu0 %v26_v7  ;;  %124 = vmatpush.msra.mxu1 %v26_v7 }
  0x12   :  { %128 = vmatpush.msra.mxu2 %v25_v8  ;;  %129 = vmatpush.msra.mxu3 %v25_v8 }
  0x13   :  { %42 = vmatpush.msra.mxu0 %v25_v8  ;;  %127 = vmatpush.msra.mxu1 %v25_v8 }
  0x14   :  { %131 = vmatpush.msra.mxu2 %v24_v9  ;;  %132 = vmatpush.msra.mxu3 %v24_v9 }
  0x15   :  { %43 = vmatpush.msra.mxu0 %v24_v9  ;;  %130 = vmatpush.msra.mxu1 %v24_v9 }
  0x16   :  { %134 = vmatpush.msra.mxu2 %v23_v10  ;;  %135 = vmatpush.msra.mxu3 %v23_v10 }
  0x17   :  { %44 = vmatpush.msra.mxu0 %v23_v10  ;;  %133 = vmatpush.msra.mxu1 %v23_v10 }
  0x18   :  { %137 = vmatpush.msra.mxu2 %v22_v11  ;;  %138 = vmatpush.msra.mxu3 %v22_v11 }
  0x19   :  { %45 = vmatpush.msra.mxu0 %v22_v11  ;;  %136 = vmatpush.msra.mxu1 %v22_v11 }
  0x1a   :  { %140 = vmatpush.msra.mxu2 %v21_v12  ;;  %141 = vmatpush.msra.mxu3 %v21_v12 }
  0x1b   :  { %46 = vmatpush.msra.mxu0 %v21_v12  ;;  %139 = vmatpush.msra.mxu1 %v21_v12 }
  0x1c   :  { %143 = vmatpush.msra.mxu2 %v20_v13  ;;  %144 = vmatpush.msra.mxu3 %v20_v13 }
  0x1d   :  { %47 = vmatpush.msra.mxu0 %v20_v13  ;;  %142 = vmatpush.msra.mxu1 %v20_v13 }
  0x1e   :  { %146 = vmatpush.msra.mxu2 %v19_v14  ;;  %147 = vmatpush.msra.mxu3 %v19_v14 }
  0x1f   :  { %48 = vmatpush.msra.mxu0 %v19_v14  ;;  %145 = vmatpush.msra.mxu1 %v19_v14 }
  0x20   :  { %149 = vmatpush.msra.mxu2 %v18_v15  ;;  %150 = vmatpush.msra.mxu3 %v18_v15 }
  0x21   :  { %56 = vmatmul.f32.vlgmr.msra.gmra.mxu2 %v16_v16  ;;  %59 = vmatmul.f32.vlgmr.msra.gmra.mxu3 %v17_v17 }
  0x22   :  { %49 = vmatpush.msra.mxu0 %v18_v15  ;;  %148 = vmatpush.msra.mxu1 %v18_v15 }
  0x23   :  { %50 = vmatmul.f32.vlgmr.msra.gmra.mxu0 %v14_v18  ;;  %53 = vmatmul.f32.vlgmr.msra.gmra.mxu1 %v15_v19 }
  0xa0   :  { %v51_v20 = vpop.f32.mrf.mxu0  ;;  %v54_v21 = vpop.f32.mrf.mxu1 }
  0xa1   :  { %63 = vst [vmem:[%s256_s2] sm:$0xff] %v51_v20  ;;  %v77_v22 = vmul.f32 %v51_v20, %v51_v20  ;;  %v67_v23 = vadd.f32 %v54_v21, %v51_v20  ;;  %v78_v24 = vmul.f32 %v54_v21, %v54_v21 }
  0xa2   :  { %64 = vst [vmem:[%s256_s2 + $0x8] sm:$0xff] %v54_v21 }
  0xa3   :  { %v81_v25 = vadd.f32 %v78_v24, %v77_v22 }
  0xa4   :  { %v57_v26 = vpop.f32.mrf.mxu2  ;;  %v60_v27 = vpop.f32.mrf.mxu3 }
  0xa5   :  { %65 = vst [vmem:[%s256_s2 + $0x10] sm:$0xff] %v57_v26  ;;  %v68_v28 = vadd.f32 %v67_v23, %v57_v26  ;;  %v79_v29 = vmul.f32 %v57_v26, %v57_v26  ;;  %v80_v30 = vmul.f32 %v60_v27, %v60_v27 }
  0xa6   :  { %66 = vst [vmem:[%s256_s2 + $0x18] sm:$0xff] %v60_v27 }
  0xa7   :  { %v82_v31 = vadd.f32 %v81_v25, %v79_v29  ;;  %v69_v32 = vadd.f32 %v68_v28, %v60_v27 }
  0xa9   :  { %v70_v33 = vrot.slane %v69_v32, 4  ;;  %v83_v34 = vadd.f32 %v82_v31, %v80_v30 }
  0xab   :  { %v71_v35 = vadd.f32 %v70_v33, %v69_v32  ;;  %v84_v36 = vrot.slane %v83_v34, 4 }
  0xad   :  { %v72_v37 = vrot.slane %v71_v35, 2  ;;  %v85_v38 = vadd.f32 %v84_v36, %v83_v34 }
  0xaf   :  { %v73_v39 = vadd.f32 %v72_v37, %v71_v35  ;;  %v86_v40 = vrot.slane %v85_v38, 2 }
  0xb1   :  { %v74_v41 = vrot.slane %v73_v39, 1  ;;  %v87_v42 = vadd.f32 %v86_v40, %v85_v38 }
  0xb3   :  { %v75_v43 = vadd.f32 %v74_v41, %v73_v39  ;;  %v88_v44 = vrot.slane %v87_v42, 1 }
  0xb5   :  { %76 = vst [vmem:[%s257_s3] sm:$0x1] %v75_v43  ;;  %v89_v45 = vadd.f32 %v88_v44, %v87_v42 }
  0xb7   :  { %90 = vst [vmem:[%s258_s4] sm:$0x1] %v89_v45 }

// kernel: fwd.6
= control target key start
LH: loop header
LB: loop body
LE: loop exit
PB: predicated region body
PF: predicated region fallthrough
CT: control target
= control target key end

     0   :  { %s325_s3 = inlined_call_operand.vmem [shape: f32[128,128], index: 3, kind: input, shape index: {}]   ;;  %s326_s1 = inlined_call_operand.vmem [shape: f32[1,128], index: 1, kind: input, shape index: {}]   ;;  %s327_s2 = inlined_call_operand.vmem [shape: f32[1,128], index: 2, kind: input, shape index: {}]   ;;  %s328_s0 = inlined_call_operand.vmem [shape: f32[32,128], index: 0, kind: input, shape index: {}]   ;;  %s329_s4 = inlined_call_operand.vmem [shape: f32[32,128], index: 4, kind: output, shape index: {0}]   ;;  %s330_s5 = inlined_call_operand.vmem [shape: f32[1,1,128], index: 5, kind: output, shape index: {1}]   ;;  %s331_s6 = inlined_call_operand.vmem [shape: f32[1,1,128], index: 6, kind: output, shape index: {2}]  }
   0x1   :  { %v59_v0 = vld [vmem:[%s325_s3 + $0x78] sm:$0xff]  ;;  %v58_v1 = vld [vmem:[%s325_s3 + $0x70] sm:$0xff]  ;;  %v57_v2 = vld [vmem:[%s325_s3 + $0x68] sm:$0xff] }
   0x2   :  { %157 = vmatpush.msra.mxu2 %v59_v0  ;;  %158 = vmatpush.msra.mxu3 %v59_v0  ;;  %v56_v3 = vld [vmem:[%s325_s3 + $0x60] sm:$0xff]  ;;  %v55_v4 = vld [vmem:[%s325_s3 + $0x58] sm:$0xff]  ;;  %v54_v5 = vld [vmem:[%s325_s3 + $0x50] sm:$0xff] }
   0x3   :  { %60 = vmatpush.msra.mxu0 %v59_v0  ;;  %156 = vmatpush.msra.mxu1 %v59_v0  ;;  %v53_v6 = vld [vmem:[%s325_s3 + $0x48] sm:$0xff]  ;;  %v52_v7 = vld [vmem:[%s325_s3 + $0x40] sm:$0xff]  ;;  %v51_v8 = vld [vmem:[%s325_s3 + $0x38] sm:$0xff] }
   0x4   :  { %160 = vmatpush.msra.mxu2 %v58_v1  ;;  %161 = vmatpush.msra.mxu3 %v58_v1  ;;  %v50_v9 = vld [vmem:[%s325_s3 + $0x30] sm:$0xff]  ;;  %v204_v10 = vld [vmem:[%s326_s1] ss:$0 sm:$0xff]  ;;  %v23_v12 = vld [vmem:[%s328_s0 + $0x18] sm:$0xff] }
   0x5   :  { %61 = vmatpush.msra.mxu0 %v58_v1  ;;  %159 = vmatpush.msra.mxu1 %v58_v1  ;;  %v22_v11 = vld [vmem:[%s328_s0 + $0x10] sm:$0xff]  ;;  %v49_v13 = vld [vmem:[%s325_s3 + $0x28] sm:$0xff]  ;;  %v20_v14 = vld [vmem:[%s328_s0] sm:$0xff]  ;;  %v31_v19 = vmul.f32 %v204_v10, %v23_v12 }
   0x6   :  { %163 = vmatpush.msra.mxu2 %v57_v2  ;;  %164 = vmatpush.msra.mxu3 %v57_v2  ;;  %v21_v15 = vld [vmem:[%s328_s0 + $0x8] sm:$0xff]  ;;  %v48_v16 = vld [vmem:[%s325_s3 + $0x20] sm:$0xff]  ;;  %v30_v17 = vmul.f32 %v204_v10, %v22_v11  ;;  %v47_v20 = vld [vmem:[%s325_s3 + $0x18] sm:$0xff]  ;;  %v28_v21 = vmul.f32 %v204_v10, %v20_v14 }
   0x7   :  { %62 = vmatpush.msra.mxu0 %v57_v2  ;;  %162 = vmatpush.msra.mxu1 %v57_v2  ;;  %v205_v18 = vld [vmem:[%s327_s2] ss:$0 sm:$0xff]  ;;  %v29_v22 = vmul.f32 %v204_v10, %v21_v15  ;;  %v46_v23 = vld [vmem:[%s325_s3 + $0x10] sm:$0xff]  ;;  %v45_v26 = vld [vmem:[%s325_s3 + $0x8] sm:$0xff] }
   0x8   :  { %166 = vmatpush.msra.mxu2 %v56_v3  ;;  %167 = vmatpush.msra.mxu3 %v56_v3  ;;  %v38_v24 = vadd.f32 %v205_v18, %v30_v17  ;;  %v39_v25 = vadd.f32 %v205_v18, %v31_v19  ;;  %v36_v27 = vadd.f32 %v205_v18, %v28_v21  ;;  %v44_v29 = vld [vmem:[%s325_s3] sm:$0xff] }
   0x9   :  { %63 = vmatpush.msra.mxu0 %v56_v3  ;;  %165 = vmatpush.msra.mxu1 %v56_v3  ;;  %v37_v28 = vadd.f32 %v205_v18, %v29_v22 }
   0xa   :  { %169 = vmatpush.msra.mxu2 %v55_v4  ;;  %170 = vmatpush.msra.mxu3 %v55_v4  ;;  %v42_v30 = vmax.f32 %v38_v24, 0.0  ;;  %v43_v31 = vmax.f32 %v39_v25, 0.0  ;;  %v40_v32 = vmax.f32 %v36_v27, 0.0 }
   0xb   :  { %64 = vmatpush.msra.mxu0 %v55_v4  ;;  %168 = vmatpush.msra.mxu1 %v55_v4  ;;  %v41_v33 = vmax.f32 %v37_v28, 0.0 }
   0xc   :  { %172 = vmatpush.msra.mxu2 %v54_v5  ;;  %173 = vmatpush.msra.mxu3 %v54_v5 }
   0xd   :  { %65 = vmatpush.msra.mxu0 %v54_v5  ;;  %171 = vmatpush.msra.mxu1 %v54_v5 }
   0xe   :  { %175 = vmatpush.msra.mxu2 %v53_v6  ;;  %176 = vmatpush.msra.mxu3 %v53_v6 }
   0xf   :  { %66 = vmatpush.msra.mxu0 %v53_v6  ;;  %174 = vmatpush.msra.mxu1 %v53_v6 }
  0x10   :  { %178 = vmatpush.msra.mxu2 %v52_v7  ;;  %179 = vmatpush.msra.mxu3 %v52_v7 }
  0x11   :  { %67 = vmatpush.msra.mxu0 %v52_v7  ;;  %177 = vmatpush.msra.mxu1 %v52_v7 }
  0x12   :  { %181 = vmatpush.msra.mxu2 %v51_v8  ;;  %182 = vmatpush.msra.mxu3 %v51_v8 }
  0x13   :  { %68 = vmatpush.msra.mxu0 %v51_v8  ;;  %180 = vmatpush.msra.mxu1 %v51_v8 }
  0x14   :  { %184 = vmatpush.msra.mxu2 %v50_v9  ;;  %185 = vmatpush.msra.mxu3 %v50_v9 }
  0x15   :  { %69 = vmatpush.msra.mxu0 %v50_v9  ;;  %183 = vmatpush.msra.mxu1 %v50_v9 }
  0x16   :  { %187 = vmatpush.msra.mxu2 %v49_v13  ;;  %188 = vmatpush.msra.mxu3 %v49_v13 }
  0x17   :  { %70 = vmatpush.msra.mxu0 %v49_v13  ;;  %186 = vmatpush.msra.mxu1 %v49_v13 }
  0x18   :  { %190 = vmatpush.msra.mxu2 %v48_v16  ;;  %191 = vmatpush.msra.mxu3 %v48_v16 }
  0x19   :  { %71 = vmatpush.msra.mxu0 %v48_v16  ;;  %189 = vmatpush.msra.mxu1 %v48_v16 }
  0x1a   :  { %193 = vmatpush.msra.mxu2 %v47_v20  ;;  %194 = vmatpush.msra.mxu3 %v47_v20 }
  0x1b   :  { %72 = vmatpush.msra.mxu0 %v47_v20  ;;  %192 = vmatpush.msra.mxu1 %v47_v20 }
  0x1c   :  { %196 = vmatpush.msra.mxu2 %v46_v23  ;;  %197 = vmatpush.msra.mxu3 %v46_v23 }
  0x1d   :  { %73 = vmatpush.msra.mxu0 %v46_v23  ;;  %195 = vmatpush.msra.mxu1 %v46_v23 }
  0x1e   :  { %199 = vmatpush.msra.mxu2 %v45_v26  ;;  %200 = vmatpush.msra.mxu3 %v45_v26 }
  0x1f   :  { %74 = vmatpush.msra.mxu0 %v45_v26  ;;  %198 = vmatpush.msra.mxu1 %v45_v26 }
  0x20   :  { %202 = vmatpush.msra.mxu2 %v44_v29  ;;  %203 = vmatpush.msra.mxu3 %v44_v29 }
  0x21   :  { %82 = vmatmul.f32.vlgmr.msra.gmra.mxu2 %v42_v30  ;;  %85 = vmatmul.f32.vlgmr.msra.gmra.mxu3 %v43_v31 }
  0x22   :  { %75 = vmatpush.msra.mxu0 %v44_v29  ;;  %201 = vmatpush.msra.mxu1 %v44_v29 }
  0x23   :  { %76 = vmatmul.f32.vlgmr.msra.gmra.mxu0 %v40_v32  ;;  %79 = vmatmul.f32.vlgmr.msra.gmra.mxu1 %v41_v33 }
  0xa0   :  { %v77_v34 = vpop.f32.mrf.mxu0  ;;  %v80_v35 = vpop.f32.mrf.mxu1 }
  0xa1   :  { %89 = vst [vmem:[%s329_s4] sm:$0xff] %v77_v34  ;;  %v130_v36 = vmul.f32 %v77_v34, %v77_v34  ;;  %v120_v37 = vadd.f32 %v80_v35, %v77_v34  ;;  %v131_v38 = vmul.f32 %v80_v35, %v80_v35 }
  0xa2   :  { %90 = vst [vmem:[%s329_s4 + $0x8] sm:$0xff] %v80_v35 }
  0xa3   :  { %v134_v39 = vadd.f32 %v131_v38, %v130_v36 }
  0xa4   :  { %v83_v40 = vpop.f32.mrf.mxu2  ;;  %v86_v41 = vpop.f32.mrf.mxu3 }
  0xa5   :  { %91 = vst [vmem:[%s329_s4 + $0x10] sm:$0xff] %v83_v40  ;;  %v121_v42 = vadd.f32 %v120_v37, %v83_v40  ;;  %v132_v43 = vmul.f32 %v83_v40, %v83_v40  ;;  %v133_v44 = vmul.f32 %v86_v41, %v86_v41 }
  0xa6   :  { %92 = vst [vmem:[%s329_s4 + $0x18] sm:$0xff] %v86_v41 }
  0xa7   :  { %v135_v45 = vadd.f32 %v134_v39, %v132_v43  ;;  %v122_v46 = vadd.f32 %v121_v42, %v86_v41 }
  0xa9   :  { %v123_v47 = vrot.slane %v122_v46, 4  ;;  %v136_v48 = vadd.f32 %v135_v45, %v133_v44 }
  0xab   :  { %v124_v49 = vadd.f32 %v123_v47, %v122_v46  ;;  %v137_v50 = vrot.slane %v136_v48, 4 }
  0xad   :  { %v125_v51 = vrot.slane %v124_v49, 2  ;;  %v138_v52 = vadd.f32 %v137_v50, %v136_v48 }
  0xaf   :  { %v126_v53 = vadd.f32 %v125_v51, %v124_v49  ;;  %v139_v54 = vrot.slane %v138_v52, 2 }
  0xb1   :  { %v127_v55 = vrot.slane %v126_v53, 1  ;;  %v140_v56 = vadd.f32 %v139_v54, %v138_v52 }
  0xb3   :  { %v128_v57 = vadd.f32 %v127_v55, %v126_v53  ;;  %v141_v58 = vrot.slane %v140_v56, 1 }
  0xb5   :  { %129 = vst [vmem:[%s330_s5] sm:$0x1] %v128_v57  ;;  %v142_v59 = vadd.f32 %v141_v58, %v140_v56 }
  0xb7   :  { %143 = vst [vmem:[%s331_s6] sm:$0x1] %v142_v59 }

// kernel: fwd.9
= control target key start
LH: loop header
LB: loop body
LE: loop exit
PB: predicated region body
PF: predicated region fallthrough
CT: control target
= control target key end

     0   :  { %s366_s15 = smov 0   ;;  %s392_s0 = inlined_call_operand.vmem [shape: f32[2,16,128], index: 0, kind: input, shape index: {}]   ;;  %s393_s1 = inlined_call_operand.vmem [shape: f32[2,16,128], index: 1, kind: input, shape index: {}]   ;;  %s394_s2 = inlined_call_operand.vmem [shape: f32[1,128], index: 2, kind: input, shape index: {}]   ;;  %s395_s3 = inlined_call_operand.vmem [shape: f32[1,128], index: 3, kind: input, shape index: {}]   ;;  %s396_s4 = inlined_call_operand.vmem [shape: f32[2,16,128], index: 4, kind: output, shape index: {}]  }
   0x1 LB: > { %s307_s16 = sadd.s32 4294967295, %s339_s15   ;;  %p311_p0 = scmp.ge.s32.totalorder %s339_s15, 1  ;;  %s339_s15 = sphi %s366_s15, %s14_s15  }
   0x2   : > { %p172_p1 = scmp.lt.s32.totalorder %s339_s15, 3 }
   0x4   : > { %p173_p2 = pnand %p311_p0, %p172_p1 }
   0x5   : > { %p203_p3 = scmp.lt.s32.totalorder (!%p173_p2), %s307_s16, 1 }
   0x6   : > { %176 = sbr.rel (%p173_p2) target bundleno = 25 (0x19), region = 36 }
   0xb   : > { %s398_s16 = smov (!%p203_p3, %s307_s16), 1  ;;  %v331_v0 = vld [vmem:[%s394_s2] ss:$0 sm:$0xff] }
   0xc   : > { %s320_s19 = sshll.u32 %s398_s16, 4  ;;  %v332_v1 = vld [vmem:[%s395_s3] ss:$0 sm:$0xff] }
   0xd   : > { %s212_s22 = scalar_lea.vmem %s393_s1, %s320_s19  ;;  %s207_s27 = scalar_lea.vmem %s392_s0, %s320_s19 }
   0xe   : > { %v220_v2 = vld [vmem:[%s212_s22] sm:$0xff]  ;;  %v221_v3 = vld [vmem:[%s212_s22 + $0x8] sm:$0xff]  ;;  %s217_s30 = scalar_lea.vmem %s396_s4, %s320_s19 }
   0xf   : > { %v226_v4 = vmul.f32 %v331_v0, %v220_v2  ;;  %v227_v5 = vmul.f32 %v331_v0, %v221_v3  ;;  %v218_v8 = vld [vmem:[%s207_s27] sm:$0xff]  ;;  %v219_v9 = vld [vmem:[%s207_s27 + $0x8] sm:$0xff] }
  0x11   : > { %v232_v6 = vadd.f32 %v332_v1, %v226_v4  ;;  %v233_v7 = vadd.f32 %v332_v1, %v227_v5 }
  0x13   : > { %v234_v10 = vmax.f32 %v232_v6, 0.0  ;;  %v235_v11 = vmax.f32 %v233_v7, 0.0 }
  0x15   : > { %v236_v12 = vadd.f32 %v234_v10, %v218_v8  ;;  %v237_v13 = vadd.f32 %v235_v11, %v219_v9 }
  0x17   : > { %238 = vst [vmem:[%s217_s30] sm:$0xff] %v236_v12 }
  0x18   : > { %239 = vst [vmem:[%s217_s30 + $0x8] sm:$0xff] %v237_v13 }
  0x19 PF: > { %s14_s15 = sadd.s32 1, %s339_s15  }
  0x1a   : > { %p11_p4 = scmp.ge.s32.totalorder %s14_s15, 4  }
  0x1c   :  { %13 = sbr.rel (!%p11_p4) target bundleno = 1 (0x1), region = 69 }

// kernel: fwd.7
= control target key start
LH: loop header
LB: loop body
LE: loop exit
PB: predicated region body
PF: predicated region fallthrough
CT: control target
= control target key end

     0   :  { %s948_s17 = smov 0   ;;  %s1160_s0 = inlined_call_operand.vmem [shape: f32[2,16,128], index: 0, kind: input, shape index: {}]   ;;  %s1161_s1 = inlined_call_operand.vmem [shape: f32[1,128], index: 1, kind: input, shape index: {}]   ;;  %s1162_s2 = inlined_call_operand.vmem [shape: f32[1,128], index: 2, kind: input, shape index: {}]   ;;  %s1163_s3 = inlined_call_operand.vmem [shape: f32[128,128], index: 3, kind: input, shape index: {}]   ;;  %s1164_s4 = inlined_call_operand.vmem [shape: f32[128,128], index: 4, kind: input, shape index: {}]   ;;  %s1165_s5 = inlined_call_operand.vmem [shape: f32[1,128], index: 5, kind: input, shape index: {}]   ;;  %s1166_s6 = inlined_call_operand.vmem [shape: f32[128,128], index: 6, kind: input, shape index: {}]   ;;  %s1167_s7 = inlined_call_operand.vmem [shape: f32[1,128], index: 7, kind: input, shape index: {}]   ;;  %s1168_s8 = inlined_call_operand.vmem [shape: f32[2,16,128], index: 8, kind: output, shape index: {0}]   ;;  %s1169_s9 = inlined_call_operand.vmem [shape: f32[2,16,128], index: 9, kind: output, shape index: {1}]   ;;  %s1170_s10 = inlined_call_operand.vmem [shape: f32[2,1,128], index: 10, kind: output, shape index: {2}]   ;;  %s1171_s11 = inlined_call_operand.vmem [shape: f32[2,1,128], index: 11, kind: output, shape index: {3}]  }
   0x1 LB: > { %s839_s18 = sadd.s32 4294967295, %s886_s17   ;;  %p843_p0 = scmp.ge.s32.totalorder %s886_s17, 1  ;;  %s886_s17 = sphi %s948_s17, %s22_s17  }
   0x2   : > { %p344_p1 = scmp.lt.s32.totalorder %s886_s17, 3 }
   0x4   : > { %p345_p2 = pnand %p843_p0, %p344_p1 }
   0x5   : > { %p395_p3 = scmp.lt.s32.totalorder (!%p345_p2), %s839_s18, 1 }
   0x6   : > { %348 = sbr.rel (%p345_p2) target bundleno = 1051 (0x41b), region = 52 }
   0xb   : > { %v449_v0 = vld [vmem:[%s1163_s3 + $0x78] sm:$0xff]  ;;  %v448_v1 = vld [vmem:[%s1163_s3 + $0x70] sm:$0xff]  ;;  %v447_v2 = vld [vmem:[%s1163_s3 + $0x68] sm:$0xff]  ;;  %s1173_s18 = smov (!%p395_p3, %s839_s18), 1  ;;  %vm539_vm0 = vcmask 130048  }
   0xc   : > { %450 = vmatpush.msra.mxu0 %v449_v0  ;;  %v446_v3 = vld [vmem:[%s1163_s3 + $0x60] sm:$0xff]  ;;  %s971_s27 = sshll.u32 %s1173_s18, 4  ;;  %v445_v4 = vld [vmem:[%s1163_s3 + $0x58] sm:$0xff]  ;;  %v444_v10 = vld [vmem:[%s1163_s3 + $0x50] sm:$0xff]  ;;  %s412_s21 = scalar_lea.vmem %s1170_s10, %s1173_s18 }
   0xd   : > { %s399_s13 = scalar_lea.vmem %s1160_s0, %s971_s27  ;;  %v866_v5 = vld [vmem:[%s1161_s1] ss:$0 sm:$0xff]  ;;  %v443_v13 = vld [vmem:[%s1163_s3 + $0x48] sm:$0xff]  ;;  %s404_s26 = scalar_lea.vmem %s1168_s8, %s971_s27  ;;  %v441_v18 = vld [vmem:[%s1163_s3 + $0x38] sm:$0xff] }
   0xe   : > { %451 = vmatpush.msra.mxu0 %v448_v1  ;;  %v416_v6 = vld [vmem:[%s399_s13] sm:$0xff]  ;;  %v417_v9 = vld [vmem:[%s399_s13 + $0x8] sm:$0xff]  ;;  %v440_v19 = vld [vmem:[%s1163_s3 + $0x30] sm:$0xff]  ;;  %s409_s19 = scalar_lea.vmem %s1169_s9, %s971_s27  ;;  %s415_s24 = scalar_lea.vmem %s1171_s11, %s1173_s18 }
   0xf   : > { %v867_v7 = vld [vmem:[%s1162_s2] ss:$0 sm:$0xff]  ;;  %v422_v8 = vmul.f32 %v866_v5, %v416_v6  ;;  %v423_v11 = vmul.f32 %v866_v5, %v417_v9  ;;  %v439_v20 = vld [vmem:[%s1163_s3 + $0x28] sm:$0xff]  ;;  %v437_v22 = vld [vmem:[%s1163_s3 + $0x18] sm:$0xff] }
  0x10   : > { %452 = vmatpush.msra.mxu0 %v447_v2  ;;  %v442_v16 = vld [vmem:[%s1163_s3 + $0x40] sm:$0xff]  ;;  %v436_v23 = vld [vmem:[%s1163_s3 + $0x10] sm:$0xff]  ;;  %v435_v24 = vld [vmem:[%s1163_s3 + $0x8] sm:$0xff] }
  0x11   : > { %v428_v12 = vadd.f32 %v867_v7, %v422_v8  ;;  %v429_v14 = vadd.f32 %v867_v7, %v423_v11  ;;  %v438_v21 = vld [vmem:[%s1163_s3 + $0x20] sm:$0xff]  ;;  %v488_v42 = vld [vmem:[%s1164_s4 + $0x78] sm:$0xff]  ;;  %v487_v43 = vld [vmem:[%s1164_s4 + $0x70] sm:$0xff] }
  0x12   : > { %453 = vmatpush.msra.mxu0 %v446_v3  ;;  %v434_v25 = vld [vmem:[%s1163_s3] sm:$0xff]  ;;  %493 = vmatpush.msra.mxu1 %v488_v42  ;;  %v486_v44 = vld [vmem:[%s1164_s4 + $0x68] sm:$0xff]  ;;  %v484_v46 = vld [vmem:[%s1164_s4 + $0x58] sm:$0xff] }
  0x13   : > { %v996_v15 = vmax.f32 %v428_v12, 0.0  ;;  %v1001_v17 = vmax.f32 %v429_v14, 0.0  ;;  %v485_v45 = vld [vmem:[%s1164_s4 + $0x60] sm:$0xff]  ;;  %v483_v47 = vld [vmem:[%s1164_s4 + $0x50] sm:$0xff]  ;;  %v482_v48 = vld [vmem:[%s1164_s4 + $0x48] sm:$0xff] }
  0x14   : > { %454 = vmatpush.msra.mxu0 %v445_v4  ;;  %494 = vmatpush.msra.mxu1 %v487_v43  ;;  %v481_v49 = vld [vmem:[%s1164_s4 + $0x40] sm:$0xff]  ;;  %v480_v50 = vld [vmem:[%s1164_s4 + $0x38] sm:$0xff]  ;;  %v479_v51 = vld [vmem:[%s1164_s4 + $0x30] sm:$0xff] }
  0x15   : > { %432 = vst [vmem:[%s404_s26] sm:$0xff] %v996_v15  ;;  %v478_v52 = vld [vmem:[%s1164_s4 + $0x28] sm:$0xff]  ;;  %v477_v54 = vld [vmem:[%s1164_s4 + $0x20] sm:$0xff]  ;;  %v476_v55 = vld [vmem:[%s1164_s4 + $0x18] sm:$0xff] }
  0x16   : > { %455 = vmatpush.msra.mxu0 %v444_v10  ;;  %433 = vst [vmem:[%s404_s26 + $0x8] sm:$0xff] %v1001_v17  ;;  %495 = vmatpush.msra.mxu1 %v486_v44  ;;  %v475_v56 = vld [vmem:[%s1164_s4 + $0x10] sm:$0xff]  ;;  %v474_v57 = vld [vmem:[%s1164_s4 + $0x8] sm:$0xff]  ;;  %v473_v59 = vld [vmem:[%s1164_s4] sm:$0xff] }
  0x17   : > { %v868_v14 = vld [vmem:[%s1165_s5] ss:$0 sm:$0xff] }
  0x18   : > { %456 = vmatpush.msra.mxu0 %v443_v13  ;;  %496 = vmatpush.msra.mxu1 %v485_v45  ;;  %v869_v42 = vld [vmem:[%s1167_s7] ss:$0 sm:$0xff] }
  0x1a   : > { %457 = vmatpush.msra.mxu0 %v442_v16  ;;  %497 = vmatpush.msra.mxu1 %v484_v46 }
  0x1c   : > { %458 = vmatpush.msra.mxu0 %v441_v18  ;;  %498 = vmatpush.msra.mxu1 %v483_v47 }
  0x1e   : > { %459 = vmatpush.msra.mxu0 %v440_v19  ;;  %499 = vmatpush.msra.mxu1 %v482_v48 }
  0x20   : > { %460 = vmatpush.msra.mxu0 %v439_v20  ;;  %500 = vmatpush.msra.mxu1 %v481_v49  ;;  %v653_v20 = vld [vmem:[%s1166_s6 + $0x78] sm:$0xff] }
  0x21   : > { %658 = vmatpush.msra.mxu3 %v653_v20 }
  0x22   : > { %461 = vmatpush.msra.mxu0 %v438_v21  ;;  %501 = vmatpush.msra.mxu1 %v480_v50  ;;  %v652_v21 = vld [vmem:[%s1166_s6 + $0x70] sm:$0xff] }
  0x23   : > { %659 = vmatpush.msra.mxu3 %v652_v21 }
  0x24   : > { %462 = vmatpush.msra.mxu0 %v437_v22  ;;  %502 = vmatpush.msra.mxu1 %v479_v51  ;;  %v651_v22 = vld [vmem:[%s1166_s6 + $0x68] sm:$0xff] }
  0x25   : > { %660 = vmatpush.msra.mxu3 %v651_v22 }
  0x26   : > { %463 = vmatpush.msra.mxu0 %v436_v23  ;;  %503 = vmatpush.msra.mxu1 %v478_v52  ;;  %v650_v23 = vld [vmem:[%s1166_s6 + $0x60] sm:$0xff] }
  0x27   : > { %661 = vmatpush.msra.mxu3 %v650_v23 }
  0x28   : > { %464 = vmatpush.msra.mxu0 %v435_v24  ;;  %504 = vmatpush.msra.mxu1 %v477_v54  ;;  %v649_v24 = vld [vmem:[%s1166_s6 + $0x58] sm:$0xff] }
  0x29   : > { %662 = vmatpush.msra.mxu3 %v649_v24 }
  0x2a   : > { %465 = vmatpush.msra.mxu0 %v434_v25  ;;  %505 = vmatpush.msra.mxu1 %v476_v55  ;;  %v648_v25 = vld [vmem:[%s1166_s6 + $0x50] sm:$0xff] }
  0x2b   : > { %466 = vmatmul.f32.vlgmr.msra.gmra.mxu0 %v996_v15  ;;  %663 = vmatpush.msra.mxu3 %v648_v25 }
  0x2c   : > { %506 = vmatpush.msra.mxu1 %v475_v56 }
  0x2e   : > { %507 = vmatpush.msra.mxu1 %v474_v57 }
  0x30   : > { %508 = vmatpush.msra.mxu1 %v473_v59 }
  0x31   : > { %509 = vmatmul.f32.vlgmr.msra.gmra.mxu1 %v996_v15 }
  0x33   : > { %469 = vmatmul.f32.gmra.mxu0 %v1001_v17 }
  0x39   : > { %512 = vmatmul.f32.gmra.mxu1 %v1001_v17 }
  0xa8   : > { %v467_v26 = vpop.f32.mrf.mxu0 }
  0xae   : > { %v510_v13 = vpop.f32.mrf.mxu1 }
  0xaf   : > { %v511_v18 = vadd.f32 %v868_v14, %v510_v13 }
  0xb0   : > { %v470_v27 = vpop.f32.mrf.mxu0 }
  0xb1   : > { %530 = vmatpush.xpose.msra.mxu2 %v470_v27 }
  0xb5   : > { %531 = vmatpush.xpose.msra.mxu2 %v467_v26 }
  0xb6   : > { %v513_v16 = vpop.f32.mrf.mxu1 }
  0xb7   : > { %v514_v19 = vadd.f32 %v868_v14, %v513_v16 }
  0xb8   : > { %532 = vmatmul.f32.vlgmr.msra.gmra.mxu2 %v467_v26  ;;  %v647_v26 = vld [vmem:[%s1166_s6 + $0x48] sm:$0xff] }
  0xb9   : > { %627 = vmatpush.msrb.mxu2 %v514_v19  ;;  %664 = vmatpush.msra.mxu3 %v647_v26 }
  0xbb   : > { %628 = vmatpush.msrb.mxu2 %v511_v18 }
  0xc0   : > { %535 = vmatmul.f32.gmra.mxu2 %v470_v27  ;;  %v646_v27 = vld [vmem:[%s1166_s6 + $0x40] sm:$0xff] }
  0xc1   : > { %665 = vmatpush.msra.mxu3 %v646_v27 }
 0x13b   : > { %v533_v28 = vpop.f32.mrf.mxu2 }
 0x13c   : > { %v540_v29 = vsel %vm539_vm0, %v533_v28, -inf }
 0x13d   : > { %541 = vmax.xlane.f32.xlu0 %v540_v29  ;;  %v644_v29 = vld [vmem:[%s1166_s6 + $0x30] sm:$0xff] }
 0x143   : > { %v536_v30 = vpop.f32.mrf.mxu2 }
 0x144   : > { %v543_v31 = vsel %vm539_vm0, %v536_v30, -inf }
 0x145   : > { %544 = vmax.xlane.f32.xlu0 %v543_v31  ;;  %v642_v31 = vld [vmem:[%s1166_s6 + $0x20] sm:$0xff] }
 0x1b0   : > { %v542_v32 = vpop.xlane.xlu0 %541 }
 0x1b1   : > { %v546_v33 = vsub.f32 %v533_v28, %v542_v32  ;;  %v645_v28 = vld [vmem:[%s1166_s6 + $0x38] sm:$0xff] }
 0x1b2   : > { %666 = vmatpush.msra.mxu3 %v645_v28  ;;  %v641_v32 = vld [vmem:[%s1166_s6 + $0x18] sm:$0xff] }
 0x1b3   : > { %v548_v34 = vmul.f32 1.442695, %v546_v33 }
 0x1b4   : > { %667 = vmatpush.msra.mxu3 %v644_v29 }
 0x1b5   : > { %870 = vpow2.f32 %v548_v34  ;;  %v640_v34 = vld [vmem:[%s1166_s6 + $0x10] sm:$0xff] }
 0x1b8   : > { %v545_v35 = vpop.xlane.xlu0 %544 }
 0x1b9   : > { %v547_v36 = vsub.f32 %v536_v30, %v545_v35  ;;  %v643_v30 = vld [vmem:[%s1166_s6 + $0x28] sm:$0xff] }
 0x1ba   : > { %668 = vmatpush.msra.mxu3 %v643_v30 }
 0x1bb   : > { %v871_v37 = vpop.eup %870  ;;  %v550_v38 = vmul.f32 1.442695, %v547_v36  ;;  %v639_v36 = vld [vmem:[%s1166_s6 + $0x8] sm:$0xff] }
 0x1bc   : > { %v552_v39 = vsel %vm539_vm0, %v871_v37, 0.0  ;;  %669 = vmatpush.msra.mxu3 %v642_v31 }
 0x1bd   : > { %872 = vpow2.f32 %v550_v38  ;;  %553 = vadd.xlane.f32.xlu1 %v552_v39 }
 0x1be   : > { %670 = vmatpush.msra.mxu3 %v641_v32 }
 0x1c0   : > { %671 = vmatpush.msra.mxu3 %v640_v34 }
 0x1c2   : > { %672 = vmatpush.msra.mxu3 %v639_v36 }
 0x1c3   : > { %v873_v40 = vpop.eup %872 }
 0x1c4   : > { %v555_v41 = vsel %vm539_vm0, %v873_v40, 0.0 }
 0x1c5   : > { %556 = vadd.xlane.f32.xlu1 %v555_v41 }
 0x230   : > { %v554_v53 = vpop.xlane.xlu1 %553 }
 0x231   : > { %874 = vrcp.f32 %v554_v53 }
 0x237   : > { %v875_v60 = vpop.eup %874 }
 0x238   : > { %v557_v58 = vpop.xlane.xlu1 %556  ;;  %v560_v61 = vmul.f32 %v875_v60, %v871_v37  ;;  %v638_v37 = vld [vmem:[%s1166_s6] sm:$0xff] }
 0x239   : > { %876 = vrcp.f32 %v557_v58  ;;  %673 = vmatpush.msra.mxu3 %v638_v37 }
 0x23a   : > { %v562_v0 = vsel %vm539_vm0, %v560_v61, 0.0 }
 0x23f   : > { %v877_v62 = vpop.eup %876 }
 0x240   : > { %v561_v63 = vmul.f32 %v877_v62, %v873_v40 }
 0x242   : > { %v563_v1 = vsel %vm539_vm0, %v561_v63, 0.0 }
 0x243   : > { %v564_v2 = vadd.f32 %v563_v1, %v562_v0 }
 0x245   : > { %v565_v3 = vrot.slane %v564_v2, 4 }
 0x247   : > { %v566_v4 = vadd.f32 %v565_v3, %v564_v2 }
 0x249   : > { %v567_v5 = vrot.slane %v566_v4, 2 }
 0x24b   : > { %v568_v6 = vadd.f32 %v567_v5, %v566_v4 }
 0x24d   : > { %v569_v7 = vrot.slane %v568_v6, 1 }
 0x24f   : > { %v570_v8 = vadd.f32 %v569_v7, %v568_v6 }
 0x251   : > { %v571_v9 = vadd.f32 1e-09, %v570_v8 }
 0x253   : > { %878 = vrcp.f32 %v571_v9 }
 0x259   : > { %v879_v10 = vpop.eup %878 }
 0x25a   : > { %v573_v11 = vmul.f32 %v879_v10, %v560_v61  ;;  %v574_v12 = vmul.f32 %v879_v10, %v561_v63 }
 0x25c   : > { %575 = vxpose.xlu2.b32.start [1/2] (short) (narrow) %v573_v11, 16 }
 0x264   : > { %576 = vxpose.xlu2.b32.end [2/2] (short) (narrow) %v574_v12, 16 }
 0x2f5   : > { %v591_v33 = vpop.trf.xlu2 }
 0x2f6   : > { %850 = vmatmul.msk.f32.vlgmr.msrb.gmra.mxu2 %vm539_vm0, %v591_v33 }
 0x2fd   : > { %v592_v35 = vpop.trf.xlu2 }
 0x2fe   : > { %851 = vmatmul.msk.f32.gmra.mxu2 %vm539_vm0, %v592_v35 }
 0x379   : > { %v630_v38 = vpop.f32.mrf.mxu2 }
 0x37a   : > { %v636_v39 = vsub.f32 %v996_v15, %v630_v38 }
 0x37c   : > { %674 = vmatmul.f32.vlgmr.msra.gmra.mxu3 %v636_v39 }
 0x381   : > { %v633_v40 = vpop.f32.mrf.mxu2 }
 0x382   : > { %v637_v41 = vsub.f32 %v1001_v17, %v633_v40 }
 0x384   : > { %677 = vmatmul.f32.gmra.mxu3 %v637_v41 }
 0x3ff   : > { %v675_v43 = vpop.f32.mrf.mxu3 }
 0x400   : > { %v676_v44 = vadd.f32 %v869_v42, %v675_v43 }
 0x402   : > { %681 = vst [vmem:[%s409_s19] sm:$0xff] %v676_v44  ;;  %v691_v15 = vmul.f32 %v676_v44, %v676_v44 }
 0x407   : > { %v678_v45 = vpop.f32.mrf.mxu3 }
 0x408   : > { %v679_v46 = vadd.f32 %v869_v42, %v678_v45 }
 0x40a   : > { %682 = vst [vmem:[%s409_s19 + $0x8] sm:$0xff] %v679_v46  ;;  %v683_v47 = vadd.f32 %v679_v46, %v676_v44  ;;  %v692_v17 = vmul.f32 %v679_v46, %v679_v46 }
 0x40c   : > { %v684_v48 = vrot.slane %v683_v47, 4  ;;  %v693_v49 = vadd.f32 %v692_v17, %v691_v15 }
 0x40e   : > { %v685_v50 = vadd.f32 %v684_v48, %v683_v47  ;;  %v694_v51 = vrot.slane %v693_v49, 4 }
 0x410   : > { %v686_v52 = vrot.slane %v685_v50, 2  ;;  %v695_v53 = vadd.f32 %v694_v51, %v693_v49 }
 0x412   : > { %v687_v54 = vadd.f32 %v686_v52, %v685_v50  ;;  %v696_v55 = vrot.slane %v695_v53, 2 }
 0x414   : > { %v688_v56 = vrot.slane %v687_v54, 1  ;;  %v697_v57 = vadd.f32 %v696_v55, %v695_v53 }
 0x416   : > { %v689_v58 = vadd.f32 %v688_v56, %v687_v54  ;;  %v698_v59 = vrot.slane %v697_v57, 1 }
 0x418   : > { %690 = vst [vmem:[%s412_s21] sm:$0x1] %v689_v58  ;;  %v699_v60 = vadd.f32 %v698_v59, %v697_v57 }
 0x41a   : > { %700 = vst [vmem:[%s415_s24] sm:$0x1] %v699_v60 }
 0x41b PF: > { %s22_s17 = sadd.s32 1, %s886_s17  }
 0x41c   : > { %p19_p4 = scmp.ge.s32.totalorder %s22_s17, 4  }
 0x41e   :  { %21 = sbr.rel (!%p19_p4) target bundleno = 1 (0x1), region = 118 }

// kernel: fwd.8
= control target key start
LH: loop header
LB: loop body
LE: loop exit
PB: predicated region body
PF: predicated region fallthrough
CT: control target
= control target key end

     0   :  { %s1019_s21 = smov 0   ;;  %s1235_s0 = inlined_call_operand.vmem [shape: f32[2,16,128], index: 0, kind: input, shape index: {}]   ;;  %s1236_s1 = inlined_call_operand.vmem [shape: f32[2,16,128], index: 1, kind: input, shape index: {}]   ;;  %s1237_s2 = inlined_call_operand.vmem [shape: f32[1,128], index: 2, kind: input, shape index: {}]   ;;  %s1238_s3 = inlined_call_operand.vmem [shape: f32[1,128], index: 3, kind: input, shape index: {}]   ;;  %s1239_s4 = inlined_call_operand.vmem [shape: f32[128,128], index: 4, kind: input, shape index: {}]   ;;  %s1240_s5 = inlined_call_operand.vmem [shape: f32[128,128], index: 5, kind: input, shape index: {}]   ;;  %s1241_s6 = inlined_call_operand.vmem [shape: f32[1,128], index: 6, kind: input, shape index: {}]   ;;  %s1242_s7 = inlined_call_operand.vmem [shape: f32[128,128], index: 7, kind: input, shape index: {}]   ;;  %s1243_s8 = inlined_call_operand.vmem [shape: f32[1,128], index: 8, kind: input, shape index: {}]   ;;  %s1244_s9 = inlined_call_operand.vmem [shape: f32[2,16,128], index: 9, kind: output, shape index: {0}]   ;;  %s1245_s10 = inlined_call_operand.vmem [shape: f32[2,16,128], index: 10, kind: output, shape index: {1}]   ;;  %s1246_s11 = inlined_call_operand.vmem [shape: f32[2,1,128], index: 11, kind: output, shape index: {2}]   ;;  %s1247_s12 = inlined_call_operand.vmem [shape: f32[2,1,128], index: 12, kind: output, shape index: {3}]  }
   0x1 LB: > { %s902_s22 = sadd.s32 4294967295, %s952_s21   ;;  %p906_p0 = scmp.ge.s32.totalorder %s952_s21, 1  ;;  %s952_s21 = sphi %s1019_s21, %s23_s21  }
   0x2   : > { %p379_p1 = scmp.lt.s32.totalorder %s952_s21, 3 }
   0x4   : > { %p380_p2 = pnand %p906_p0, %p379_p1 }
   0x5   : > { %p437_p3 = scmp.lt.s32.totalorder (!%p380_p2), %s902_s22, 1 }
   0x6   : > { %383 = sbr.rel (%p380_p2) target bundleno = 1051 (0x41b), region = 56 }
   0xb   : > { %v500_v0 = vld [vmem:[%s1239_s4 + $0x78] sm:$0xff]  ;;  %v499_v1 = vld [vmem:[%s1239_s4 + $0x70] sm:$0xff]  ;;  %v498_v2 = vld [vmem:[%s1239_s4 + $0x68] sm:$0xff]  ;;  %s1249_s22 = smov (!%p437_p3, %s902_s22), 1  ;;  %vm590_vm0 = vcmask 130048  }
   0xc   : > { %501 = vmatpush.msra.mxu0 %v500_v0  ;;  %v497_v3 = vld [vmem:[%s1239_s4 + $0x60] sm:$0xff]  ;;  %s1042_s13 = sshll.u32 %s1249_s22, 4  ;;  %v496_v4 = vld [vmem:[%s1239_s4 + $0x58] sm:$0xff]  ;;  %v495_v10 = vld [vmem:[%s1239_s4 + $0x50] sm:$0xff]  ;;  %s462_s23 = scalar_lea.vmem %s1247_s12, %s1249_s22 }
   0xd   : > { %s446_s18 = scalar_lea.vmem %s1236_s1, %s1042_s13  ;;  %v932_v5 = vld [vmem:[%s1237_s2] ss:$0 sm:$0xff]  ;;  %s441_s27 = scalar_lea.vmem %s1235_s0, %s1042_s13  ;;  %v494_v13 = vld [vmem:[%s1239_s4 + $0x48] sm:$0xff]  ;;  %v492_v21 = vld [vmem:[%s1239_s4 + $0x38] sm:$0xff] }
   0xe   : > { %502 = vmatpush.msra.mxu0 %v499_v1  ;;  %v463_v6 = vld [vmem:[%s446_s18] sm:$0xff]  ;;  %v464_v9 = vld [vmem:[%s446_s18 + $0x8] sm:$0xff]  ;;  %s451_s19 = scalar_lea.vmem %s1244_s9, %s1042_s13  ;;  %v491_v23 = vld [vmem:[%s1239_s4 + $0x30] sm:$0xff]  ;;  %s456_s16 = scalar_lea.vmem %s1245_s10, %s1042_s13 }
   0xf   : > { %v933_v7 = vld [vmem:[%s1238_s3] ss:$0 sm:$0xff]  ;;  %v469_v8 = vmul.f32 %v932_v5, %v463_v6  ;;  %v470_v11 = vmul.f32 %v932_v5, %v464_v9  ;;  %v480_v17 = vld [vmem:[%s441_s27 + $0x8] sm:$0xff]  ;;  %v488_v26 = vld [vmem:[%s1239_s4 + $0x18] sm:$0xff]  ;;  %s459_s18 = scalar_lea.vmem %s1246_s11, %s1249_s22 }
  0x10   : > { %503 = vmatpush.msra.mxu0 %v498_v2  ;;  %v479_v14 = vld [vmem:[%s441_s27] sm:$0xff]  ;;  %v490_v24 = vld [vmem:[%s1239_s4 + $0x28] sm:$0xff]  ;;  %v487_v27 = vld [vmem:[%s1239_s4 + $0x10] sm:$0xff] }
  0x11   : > { %v475_v12 = vadd.f32 %v933_v7, %v469_v8  ;;  %v476_v15 = vadd.f32 %v933_v7, %v470_v11  ;;  %v493_v18 = vld [vmem:[%s1239_s4 + $0x40] sm:$0xff]  ;;  %v486_v28 = vld [vmem:[%s1239_s4 + $0x8] sm:$0xff]  ;;  %v539_v46 = vld [vmem:[%s1240_s5 + $0x78] sm:$0xff] }
  0x12   : > { %504 = vmatpush.msra.mxu0 %v497_v3  ;;  %v489_v25 = vld [vmem:[%s1239_s4 + $0x20] sm:$0xff]  ;;  %v538_v47 = vld [vmem:[%s1240_s5 + $0x70] sm:$0xff]  ;;  %544 = vmatpush.msra.mxu1 %v539_v46  ;;  %v537_v48 = vld [vmem:[%s1240_s5 + $0x68] sm:$0xff] }
  0x13   : > { %v477_v16 = vmax.f32 %v475_v12, 0.0  ;;  %v478_v19 = vmax.f32 %v476_v15, 0.0  ;;  %v485_v29 = vld [vmem:[%s1239_s4] sm:$0xff]  ;;  %v535_v50 = vld [vmem:[%s1240_s5 + $0x58] sm:$0xff]  ;;  %v534_v51 = vld [vmem:[%s1240_s5 + $0x50] sm:$0xff] }
  0x14   : > { %505 = vmatpush.msra.mxu0 %v496_v4  ;;  %545 = vmatpush.msra.mxu1 %v538_v47  ;;  %v536_v49 = vld [vmem:[%s1240_s5 + $0x60] sm:$0xff]  ;;  %v533_v52 = vld [vmem:[%s1240_s5 + $0x48] sm:$0xff]  ;;  %v531_v54 = vld [vmem:[%s1240_s5 + $0x38] sm:$0xff] }
  0x15   : > { %v1074_v20 = vadd.f32 %v479_v14, %v477_v16  ;;  %v1079_v22 = vadd.f32 %v480_v17, %v478_v19  ;;  %v532_v53 = vld [vmem:[%s1240_s5 + $0x40] sm:$0xff]  ;;  %v530_v55 = vld [vmem:[%s1240_s5 + $0x30] sm:$0xff]  ;;  %v529_v56 = vld [vmem:[%s1240_s5 + $0x28] sm:$0xff] }
  0x16   : > { %506 = vmatpush.msra.mxu0 %v495_v10  ;;  %546 = vmatpush.msra.mxu1 %v537_v48  ;;  %v528_v58 = vld [vmem:[%s1240_s5 + $0x20] sm:$0xff]  ;;  %v527_v59 = vld [vmem:[%s1240_s5 + $0x18] sm:$0xff]  ;;  %v526_v60 = vld [vmem:[%s1240_s5 + $0x10] sm:$0xff] }
  0x17   : > { %483 = vst [vmem:[%s451_s19] sm:$0xff] %v1074_v20  ;;  %v525_v61 = vld [vmem:[%s1240_s5 + $0x8] sm:$0xff]  ;;  %v524_v63 = vld [vmem:[%s1240_s5] sm:$0xff] }
  0x18   : > { %507 = vmatpush.msra.mxu0 %v494_v13  ;;  %484 = vst [vmem:[%s451_s19 + $0x8] sm:$0xff] %v1079_v22  ;;  %547 = vmatpush.msra.mxu1 %v536_v49  ;;  %v935_v46 = vld [vmem:[%s1243_s8] ss:$0 sm:$0xff] }
  0x1a   : > { %508 = vmatpush.msra.mxu0 %v493_v18  ;;  %548 = vmatpush.msra.mxu1 %v535_v50  ;;  %v934_v18 = vld [vmem:[%s1241_s6] ss:$0 sm:$0xff] }
  0x1c   : > { %509 = vmatpush.msra.mxu0 %v492_v21  ;;  %549 = vmatpush.msra.mxu1 %v534_v51 }
  0x1e   : > { %510 = vmatpush.msra.mxu0 %v491_v23  ;;  %550 = vmatpush.msra.mxu1 %v533_v52 }
  0x20   : > { %511 = vmatpush.msra.mxu0 %v490_v24  ;;  %551 = vmatpush.msra.mxu1 %v532_v53  ;;  %v704_v24 = vld [vmem:[%s1242_s7 + $0x78] sm:$0xff] }
  0x21   : > { %709 = vmatpush.msra.mxu3 %v704_v24 }
  0x22   : > { %512 = vmatpush.msra.mxu0 %v489_v25  ;;  %552 = vmatpush.msra.mxu1 %v531_v54  ;;  %v703_v25 = vld [vmem:[%s1242_s7 + $0x70] sm:$0xff] }
  0x23   : > { %710 = vmatpush.msra.mxu3 %v703_v25 }
  0x24   : > { %513 = vmatpush.msra.mxu0 %v488_v26  ;;  %553 = vmatpush.msra.mxu1 %v530_v55  ;;  %v702_v26 = vld [vmem:[%s1242_s7 + $0x68] sm:$0xff] }
  0x25   : > { %711 = vmatpush.msra.mxu3 %v702_v26 }
  0x26   : > { %514 = vmatpush.msra.mxu0 %v487_v27  ;;  %554 = vmatpush.msra.mxu1 %v529_v56  ;;  %v701_v27 = vld [vmem:[%s1242_s7 + $0x60] sm:$0xff] }
  0x27   : > { %712 = vmatpush.msra.mxu3 %v701_v27 }
  0x28   : > { %515 = vmatpush.msra.mxu0 %v486_v28  ;;  %555 = vmatpush.msra.mxu1 %v528_v58  ;;  %v700_v28 = vld [vmem:[%s1242_s7 + $0x58] sm:$0xff] }
  0x29   : > { %713 = vmatpush.msra.mxu3 %v700_v28 }
  0x2a   : > { %516 = vmatpush.msra.mxu0 %v485_v29  ;;  %556 = vmatpush.msra.mxu1 %v527_v59  ;;  %v699_v29 = vld [vmem:[%s1242_s7 + $0x50] sm:$0xff] }
  0x2b   : > { %517 = vmatmul.f32.vlgmr.msra.gmra.mxu0 %v1074_v20  ;;  %714 = vmatpush.msra.mxu3 %v699_v29 }
  0x2c   : > { %557 = vmatpush.msra.mxu1 %v526_v60 }
  0x2e   : > { %558 = vmatpush.msra.mxu1 %v525_v61 }
  0x30   : > { %559 = vmatpush.msra.mxu1 %v524_v63 }
  0x31   : > { %560 = vmatmul.f32.vlgmr.msra.gmra.mxu1 %v1074_v20 }
  0x33   : > { %520 = vmatmul.f32.gmra.mxu0 %v1079_v22 }
  0x39   : > { %563 = vmatmul.f32.gmra.mxu1 %v1079_v22 }
  0xa8   : > { %v518_v30 = vpop.f32.mrf.mxu0 }
  0xae   : > { %v561_v17 = vpop.f32.mrf.mxu1 }
  0xaf   : > { %v562_v21 = vadd.f32 %v934_v18, %v561_v17 }
  0xb0   : > { %v521_v31 = vpop.f32.mrf.mxu0 }
  0xb1   : > { %581 = vmatpush.xpose.msra.mxu2 %v521_v31 }
  0xb5   : > { %582 = vmatpush.xpose.msra.mxu2 %v518_v30 }
  0xb6   : > { %v564_v19 = vpop.f32.mrf.mxu1 }
  0xb7   : > { %v565_v23 = vadd.f32 %v934_v18, %v564_v19 }
  0xb8   : > { %583 = vmatmul.f32.vlgmr.msra.gmra.mxu2 %v518_v30  ;;  %v698_v30 = vld [vmem:[%s1242_s7 + $0x48] sm:$0xff] }
  0xb9   : > { %678 = vmatpush.msrb.mxu2 %v565_v23  ;;  %715 = vmatpush.msra.mxu3 %v698_v30 }
  0xbb   : > { %679 = vmatpush.msrb.mxu2 %v562_v21 }
  0xc0   : > { %586 = vmatmul.f32.gmra.mxu2 %v521_v31  ;;  %v697_v31 = vld [vmem:[%s1242_s7 + $0x40] sm:$0xff] }
  0xc1   : > { %716 = vmatpush.msra.mxu3 %v697_v31 }
 0x13b   : > { %v584_v32 = vpop.f32.mrf.mxu2 }
 0x13c   : > { %v591_v33 = vsel %vm590_vm0, %v584_v32, -inf }
 0x13d   : > { %592 = vmax.xlane.f32.xlu0 %v591_v33  ;;  %v695_v33 = vld [vmem:[%s1242_s7 + $0x30] sm:$0xff] }
 0x143   : > { %v587_v34 = vpop.f32.mrf.mxu2 }
 0x144   : > { %v594_v35 = vsel %vm590_vm0, %v587_v34, -inf }
 0x145   : > { %595 = vmax.xlane.f32.xlu0 %v594_v35  ;;  %v693_v35 = vld [vmem:[%s1242_s7 + $0x20] sm:$0xff] }
 0x1b0   : > { %v593_v36 = vpop.xlane.xlu0 %592 }
 0x1b1   : > { %v597_v37 = vsub.f32 %v584_v32, %v593_v36  ;;  %v696_v32 = vld [vmem:[%s1242_s7 + $0x38] sm:$0xff] }
 0x1b2   : > { %717 = vmatpush.msra.mxu3 %v696_v32  ;;  %v692_v36 = vld [vmem:[%s1242_s7 + $0x18] sm:$0xff] }
 0x1b3   : > { %v599_v38 = vmul.f32 1.442695, %v597_v37 }
 0x1b4   : > { %718 = vmatpush.msra.mxu3 %v695_v33 }
 0x1b5   : > { %936 = vpow2.f32 %v599_v38  ;;  %v691_v38 = vld [vmem:[%s1242_s7 + $0x10] sm:$0xff] }
 0x1b8   : > { %v596_v39 = vpop.xlane.xlu0 %595 }
 0x1b9   : > { %v598_v40 = vsub.f32 %v587_v34, %v596_v39  ;;  %v694_v34 = vld [vmem:[%s1242_s7 + $0x28] sm:$0xff] }
 0x1ba   : > { %719 = vmatpush.msra.mxu3 %v694_v34 }
 0x1bb   : > { %v937_v41 = vpop.eup %936  ;;  %v601_v42 = vmul.f32 1.442695, %v598_v40  ;;  %v690_v40 = vld [vmem:[%s1242_s7 + $0x8] sm:$0xff] }
 0x1bc   : > { %v603_v43 = vsel %vm590_vm0, %v937_v41, 0.0  ;;  %720 = vmatpush.msra.mxu3 %v693_v35 }
 0x1bd   : > { %938 = vpow2.f32 %v601_v42  ;;  %604 = vadd.xlane.f32.xlu1 %v603_v43 }
 0x1be   : > { %721 = vmatpush.msra.mxu3 %v692_v36 }
 0x1c0   : > { %722 = vmatpush.msra.mxu3 %v691_v38 }
 0x1c2   : > { %723 = vmatpush.msra.mxu3 %v690_v40 }
 0x1c3   : > { %v939_v44 = vpop.eup %938 }
 0x1c4   : > { %v606_v45 = vsel %vm590_vm0, %v939_v44, 0.0 }
 0x1c5   : > { %607 = vadd.xlane.f32.xlu1 %v606_v45 }
 0x230   : > { %v605_v57 = vpop.xlane.xlu1 %604 }
 0x231   : > { %940 = vrcp.f32 %v605_v57 }
 0x237   : > { %v941_v0 = vpop.eup %940 }
 0x238   : > { %v608_v62 = vpop.xlane.xlu1 %607  ;;  %v611_v1 = vmul.f32 %v941_v0, %v937_v41  ;;  %v689_v41 = vld [vmem:[%s1242_s7] sm:$0xff] }
 0x239   : > { %942 = vrcp.f32 %v608_v62  ;;  %724 = vmatpush.msra.mxu3 %v689_v41 }
 0x23a   : > { %v613_v4 = vsel %vm590_vm0, %v611_v1, 0.0 }
 0x23f   : > { %v943_v2 = vpop.eup %942 }
 0x240   : > { %v612_v3 = vmul.f32 %v943_v2, %v939_v44 }
 0x242   : > { %v614_v5 = vsel %vm590_vm0, %v612_v3, 0.0 }
 0x243   : > { %v615_v6 = vadd.f32 %v614_v5, %v613_v4 }
 0x245   : > { %v616_v7 = vrot.slane %v615_v6, 4 }
 0x247   : > { %v617_v8 = vadd.f32 %v616_v7, %v615_v6 }
 0x249   : > { %v618_v9 = vrot.slane %v617_v8, 2 }
 0x24b   : > { %v619_v10 = vadd.f32 %v618_v9, %v617_v8 }
 0x24d   : > { %v620_v11 = vrot.slane %v619_v10, 1 }
 0x24f   : > { %v621_v12 = vadd.f32 %v620_v11, %v619_v10 }
 0x251   : > { %v622_v13 = vadd.f32 1e-09, %v621_v12 }
 0x253   : > { %944 = vrcp.f32 %v622_v13 }
 0x259   : > { %v945_v14 = vpop.eup %944 }
 0x25a   : > { %v624_v15 = vmul.f32 %v945_v14, %v611_v1  ;;  %v625_v16 = vmul.f32 %v945_v14, %v612_v3 }
 0x25c   : > { %626 = vxpose.xlu2.b32.start [1/2] (short) (narrow) %v624_v15, 16 }
 0x264   : > { %627 = vxpose.xlu2.b32.end [2/2] (short) (narrow) %v625_v16, 16 }
 0x2f5   : > { %v642_v37 = vpop.trf.xlu2 }
 0x2f6   : > { %915 = vmatmul.msk.f32.vlgmr.msrb.gmra.mxu2 %vm590_vm0, %v642_v37 }
 0x2fd   : > { %v643_v39 = vpop.trf.xlu2 }
 0x2fe   : > { %916 = vmatmul.msk.f32.gmra.mxu2 %vm590_vm0, %v643_v39 }
 0x379   : > { %v681_v42 = vpop.f32.mrf.mxu2 }
 0x37a   : > { %v687_v43 = vsub.f32 %v1074_v20, %v681_v42 }
 0x37c   : > { %725 = vmatmul.f32.vlgmr.msra.gmra.mxu3 %v687_v43 }
 0x381   : > { %v684_v44 = vpop.f32.mrf.mxu2 }
 0x382   : > { %v688_v45 = vsub.f32 %v1079_v22, %v684_v44 }
 0x384   : > { %728 = vmatmul.f32.gmra.mxu3 %v688_v45 }
 0x3ff   : > { %v726_v47 = vpop.f32.mrf.mxu3 }
 0x400   : > { %v727_v48 = vadd.f32 %v935_v46, %v726_v47 }
 0x402   : > { %732 = vst [vmem:[%s456_s16] sm:$0xff] %v727_v48  ;;  %v742_v20 = vmul.f32 %v727_v48, %v727_v48 }
 0x407   : > { %v729_v49 = vpop.f32.mrf.mxu3 }
 0x408   : > { %v730_v50 = vadd.f32 %v935_v46, %v729_v49 }
 0x40a   : > { %733 = vst [vmem:[%s456_s16 + $0x8] sm:$0xff] %v730_v50  ;;  %v734_v51 = vadd.f32 %v730_v50, %v727_v48  ;;  %v743_v22 = vmul.f32 %v730_v50, %v730_v50 }
 0x40c   : > { %v735_v52 = vrot.slane %v734_v51, 4  ;;  %v744_v53 = vadd.f32 %v743_v22, %v742_v20 }
 0x40e   : > { %v736_v54 = vadd.f32 %v735_v52, %v734_v51  ;;  %v745_v55 = vrot.slane %v744_v53, 4 }
 0x410   : > { %v737_v56 = vrot.slane %v736_v54, 2  ;;  %v746_v57 = vadd.f32 %v745_v55, %v744_v53 }
 0x412   : > { %v738_v58 = vadd.f32 %v737_v56, %v736_v54  ;;  %v747_v59 = vrot.slane %v746_v57, 2 }
 0x414   : > { %v739_v60 = vrot.slane %v738_v58, 1  ;;  %v748_v61 = vadd.f32 %v747_v59, %v746_v57 }
 0x416   : > { %v740_v62 = vadd.f32 %v739_v60, %v738_v58  ;;  %v749_v63 = vrot.slane %v748_v61, 1 }
 0x418   : > { %741 = vst [vmem:[%s459_s18] sm:$0x1] %v740_v62  ;;  %v750_v0 = vadd.f32 %v749_v63, %v748_v61 }
 0x41a   : > { %751 = vst [vmem:[%s462_s23] sm:$0x1] %v750_v0 }
 0x41b PF: > { %s23_s21 = sadd.s32 1, %s952_s21  }
 0x41c   : > { %p20_p4 = scmp.ge.s32.totalorder %s23_s21, 4  }
 0x41e   :  { %22 = sbr.rel (!%p20_p4) target bundleno = 1 (0x1), region = 125 }

</bundles_post_ra>
